<compile_context>
chip_gen: v6e
topology: v6e:2x2x1
jax: 0.10.0
libtpu: 0.0.40
codegen_flags: <defaults>
</compile_context>

<pallas_src>
from typing import List, NamedTuple, Tuple

import jax
import jax.numpy as jnp
from jax.experimental import pallas as pl
from jax.experimental.pallas import tpu as pltpu


# ------------------------------ small helpers ------------------------------

def _round_up(v: int, m: int) -> int:
    return ((v + m - 1) // m) * m


def _pick_tile(n: int, candidates) -> int:
    for c in candidates:
        if n % c == 0:
            return c
    return n


# --------------------------- one-time preprocessing -------------------------

def prepare_adjacency(edge_index, num_nodes: int, n_pad: int):
    """Dense D^{-1/2}(A+I)D^{-1/2}, zero-padded to [n_pad, n_pad], in bfloat16.

    Hoisted out of the forward pass: it depends only on the graph, not on the
    weights, so it is computed once per graph.
    """
    src, dst = edge_index[0], edge_index[1]
    a = jnp.zeros((num_nodes, num_nodes), jnp.float32)
    a = a.at[src, dst].set(1.0)
    a = a.at[dst, src].set(1.0)                      # undirected
    a = a + jnp.eye(num_nodes, dtype=jnp.float32)    # self loops
    d_inv_sqrt = jax.lax.rsqrt(jnp.sum(a, axis=1))
    a = a * d_inv_sqrt[:, None] * d_inv_sqrt[None, :]
    a_pad = jnp.zeros((n_pad, n_pad), jnp.bfloat16)
    return a_pad.at[:num_nodes, :num_nodes].set(a.astype(jnp.bfloat16))


class PreppedModel(NamedTuple):
    wg: jnp.ndarray                 # [L, H_PAD, H_PAD] f32, zero-padded GCN weights
    bg: jnp.ndarray                 # [L, 1, H_PAD]     f32, zero-padded GCN biases
    mlp: Tuple[Tuple[jnp.ndarray, jnp.ndarray], ...]   # padded (W, b) per MLP layer
    mlp_relu: Tuple[bool, ...]
    h_pad: int                      # padded GCN feature width (multiple of 128)
    out_dim: int                    # true number of output features
    out_cols: int                   # padded output width (multiple of 128)


def prepare_model(f_in: int, gconv_params: List, mlp_params: List) -> PreppedModel:
    """Zero-pad all weights to lane-dense (multiple-of-128) shapes, done once."""
    assert mlp_params, "GConvModel.forward requires mlp_blocks (matches the PyTorch module)"
    gcn_dims = tuple(int(w.shape[1]) for w, _ in gconv_params)
    n_gcn = len(gconv_params)
    h_pad = _round_up(max((f_in,) + gcn_dims), 128)

    wg = jnp.zeros((n_gcn, h_pad, h_pad), jnp.float32)
    bg = jnp.zeros((n_gcn, 1, h_pad), jnp.float32)
    in_dims = (f_in,) + gcn_dims[:-1]
    for li, (w, b) in enumerate(gconv_params):
        wg = wg.at[li, : in_dims[li], : gcn_dims[li]].set(w)
        bg = bg.at[li, :, : gcn_dims[li]].set(b.reshape(1, -1))

    mlp_padded = []
    mlp_relu = []
    prev_pad = None
    prev_dim = None
    for j, (w, b, relu) in enumerate(mlp_params):
        d_in, d_out = int(w.shape[0]), int(w.shape[1])
        d_out_pad = _round_up(d_out, 128)
        if j == 0:
            # The first MLP layer consumes the concat of the GCN outputs; its
            # rows are laid out per GCN block at stride h_pad so they line up
            # with the VMEM concat slab used inside the kernel.
            assert d_in == sum(gcn_dims)
            wp = jnp.zeros((n_gcn * h_pad, d_out_pad), jnp.float32)
            row_off = 0
            for li, h in enumerate(gcn_dims):
                wp = wp.at[li * h_pad: li * h_pad + h, :d_out].set(
                    w[row_off: row_off + h, :])
                row_off += h
        else:
            wp = jnp.zeros((prev_pad, d_out_pad), jnp.float32)
            wp = wp.at[:d_in, :d_out].set(w)
        bp = jnp.zeros((1, d_out_pad), jnp.float32).at[:, :d_out].set(b.reshape(1, -1))
        mlp_padded.append((wp, bp))
        mlp_relu.append(bool(relu))
        prev_pad, prev_dim = d_out_pad, d_out

    return PreppedModel(wg=wg, bg=bg, mlp=tuple(mlp_padded),
                        mlp_relu=tuple(mlp_relu), h_pad=h_pad,
                        out_dim=prev_dim, out_cols=prev_pad)


# ------------------------------ fused forward -------------------------------

def gconv_forward(a_hat_pad, x, prep: PreppedModel):
    """Fused GConvModel forward: GCN blocks -> concat (in VMEM) -> MLP head."""
    n, f_in = x.shape
    n_pad = a_hat_pad.shape[0]
    h_pad = prep.h_pad
    n_gcn = int(prep.wg.shape[0])
    n_mlp = len(prep.mlp)
    out_cols = prep.out_cols
    mlp_relu = prep.mlp_relu

    x_pad = jnp.zeros((n_pad, h_pad), jnp.float32).at[:n, :f_in].set(x)

    tm = _pick_tile(n_pad, (256, 128))       # row tile of A_hat
    tk = _pick_tile(n_pad, (512, 256, 128))  # reduction tile of A_hat
    mt, kt = n_pad // tm, n_pad // tk

    def kernel(a_ref, x_ref, wg_ref, bg_ref, *args):
        mlp_refs = args[: 2 * n_mlp]          # (W, b) pairs, VMEM-resident
        out_ref = args[2 * n_mlp]
        xw_ref = args[2 * n_mlp + 1]          # [n_pad, h_pad] bf16 : input_l @ W_l
        acc_ref = args[2 * n_mlp + 2]         # [tm, h_pad] f32 accumulator
        layer_refs = args[2 * n_mlp + 3:]     # per-layer concat slab blocks

        l = pl.program_id(0)
        i = pl.program_id(1)
        k = pl.program_id(2)

        # ---- once per GCN layer: materialize XW_l = input_l @ W_l in VMEM ----
        @pl.when(jnp.logical_and(i == 0, k == 0))
        def _():
            w_l = wg_ref[0]                                   # (h_pad, h_pad) f32

            @pl.when(l == 0)
            def _():
                xw_ref[...] = jnp.dot(
                    x_ref[...], w_l, preferred_element_type=jnp.float32
                ).astype(xw_ref.dtype)

            for li in range(1, n_gcn):
                @pl.when(l == li)
                def _(li=li):
                    xw_ref[...] = jnp.dot(
                        layer_refs[li - 1][...], w_l,
                        preferred_element_type=jnp.float32,
                    ).astype(xw_ref.dtype)

        # ---- reduction over A_hat K-tiles (bf16 MXU, f32 accumulate) ----
        @pl.when(k == 0)
        def _():
            acc_ref[...] = jnp.zeros_like(acc_ref)

        k_start = pl.multiple_of(k * tk, tk)
        acc_ref[...] += jnp.dot(
            a_ref[...], xw_ref[pl.ds(k_start, tk), :],
            preferred_element_type=jnp.float32,
        )

        # ---- row-tile epilogue: bias + ReLU, write into this layer's slab ----
        @pl.when(k == kt - 1)
        def _():
            h_tile = jnp.maximum(acc_ref[...] + bg_ref[0], 0.0)
            r_start = pl.multiple_of(i * tm, tm)
            for li in range(n_gcn):
                @pl.when(l == li)
                def _(li=li):
                    layer_refs[li][pl.ds(r_start, tm), :] = h_tile

        # ---- last grid step: fused MLP head on the VMEM-resident concat ----
        is_last = jnp.logical_and(
            l == n_gcn - 1, jnp.logical_and(i == mt - 1, k == kt - 1))

        @pl.when(is_last)
        def _():
            # First MLP layer: fold the concat into a sum of per-block matmuls
            # (padded W rows for block li live at row offset li * h_pad).
            m = None
            for li in range(n_gcn):
                part = jnp.dot(
                    layer_refs[li][...],
                    mlp_refs[0][li * h_pad:(li + 1) * h_pad, :],
                    preferred_element_type=jnp.float32,
                )
                m = part if m is None else m + part
            m = m + mlp_refs[1][...]
            if mlp_relu[0]:
                m = jnp.maximum(m, 0.0)
            for j in range(1, n_mlp):
                m = jnp.dot(m, mlp_refs[2 * j][...],
                            preferred_element_type=jnp.float32)
                m = m + mlp_refs[2 * j + 1][...]
                if mlp_relu[j]:
                    m = jnp.maximum(m, 0.0)
            out_ref[...] = m.astype(out_ref.dtype)

    in_specs = [
        pl.BlockSpec((tm, tk), lambda l, i, k: (i, k)),               # A_hat tiles (bf16)
        pl.BlockSpec((n_pad, h_pad), lambda l, i, k: (0, 0)),         # X, VMEM-resident
        pl.BlockSpec((1, h_pad, h_pad), lambda l, i, k: (l, 0, 0)),   # W_gcn[l]
        pl.BlockSpec((1, 1, h_pad), lambda l, i, k: (l, 0, 0)),       # b_gcn[l]
    ]
    for w_p, b_p in prep.mlp:                                         # MLP params, resident
        in_specs.append(pl.BlockSpec(w_p.shape, lambda l, i, k: (0, 0)))
        in_specs.append(pl.BlockSpec(b_p.shape, lambda l, i, k: (0, 0)))

    flat_mlp = [arr for pair in prep.mlp for arr in pair]

    out_pad = pl.pallas_call(
        kernel,
        out_shape=jax.ShapeDtypeStruct((n_pad, out_cols), jnp.float32),
        grid_spec=pltpu.PrefetchScalarGridSpec(
            num_scalar_prefetch=0,
            grid=(n_gcn, mt, kt),                    # reduction axis last
            in_specs=in_specs,
            out_specs=pl.BlockSpec((n_pad, out_cols), lambda l, i, k: (0, 0)),
            scratch_shapes=(
                [pltpu.VMEM((n_pad, h_pad), jnp.bfloat16),   # XW_l
                 pltpu.VMEM((tm, h_pad), jnp.float32)]       # f32 accumulator
                + [pltpu.VMEM((n_pad, h_pad), jnp.float32)   # concat slab blocks
                   for _ in range(n_gcn)]
            ),
        ),
        compiler_params=pltpu.CompilerParams(
            # Scratch carries state across all axes -> must stay sequential.
            dimension_semantics=("arbitrary", "arbitrary", "arbitrary"),
            vmem_limit_bytes=32 * 1024 * 1024,
        ),
    )(a_hat_pad, x_pad, prep.wg, prep.bg, *flat_mlp)

    return out_pad[:n, :prep.out_dim]


# ------------------------------ pure-JAX reference ---------------------------

def reference_forward(x, edge_index, gconv_params, mlp_params):
    n = x.shape[0]
    src, dst = edge_index[0], edge_index[1]
    a = jnp.zeros((n, n), jnp.float32)
    a = a.at[src, dst].set(1.0)
    a = a.at[dst, src].set(1.0)
    a = a + jnp.eye(n, dtype=jnp.float32)
    d = jax.lax.rsqrt(jnp.sum(a, axis=1))
    a = a * d[:, None] * d[None, :]
    aggr = []
    h = x
    for w, b in gconv_params:
        h = jnp.maximum(a @ (h @ w) + b.reshape(1, -1), 0.0)
        aggr.append(h)
    h = jnp.concatenate(aggr, axis=-1)
    for w, b, relu in mlp_params:
        h = h @ w + b.reshape(1, -1)
        if relu:
            h = jnp.maximum(h, 0.0)
    return h


# ----------------------------------- main ------------------------------------

def _init_linear(key, f_in, f_out):
    kw, kb = jax.random.split(key)
    scale = 1.0 / jnp.sqrt(jnp.float32(f_in))
    w = jax.random.uniform(kw, (f_in, f_out), jnp.float32, -scale, scale)
    b = jax.random.uniform(kb, (1, f_out), jnp.float32, -scale, scale)
    return w, b


if __name__ == "__main__":
    key = jax.random.PRNGKey(0)
    k_x, k_g1, k_g2, k_m1, k_m2 = jax.random.split(key, 5)

    # Small graph: 16 nodes, 8 input features.
    num_nodes, f_in = 16, 8
    hidden1, hidden2 = 16, 16
    mlp_hidden, num_classes = 32, 4

    x = jax.random.normal(k_x, (num_nodes, f_in), jnp.float32)

    # Ring graph edges (deterministic).
    src = jnp.arange(num_nodes, dtype=jnp.int32)
    dst = (src + 1) % num_nodes
    edge_index = jnp.stack([src, dst], axis=0)       # [2, E]

    # Two GConv blocks (GCNConv + ReLU each).
    gconv_params = [
        _init_linear(k_g1, f_in, hidden1),
        _init_linear(k_g2, hidden1, hidden2),
    ]
    # Two MLP blocks: Linear+ReLU, then Linear (logits).
    w1, b1 = _init_linear(k_m1, hidden1 + hidden2, mlp_hidden)
    w2, b2 = _init_linear(k_m2, mlp_hidden, num_classes)
    mlp_params = [(w1, b1, True), (w2, b2, False)]

    # One-time preprocessing (hoisted out of the hot forward path).
    prep = prepare_model(f_in, gconv_params, mlp_params)
    n_pad = _round_up(max(num_nodes, 8), 128)
    a_hat = prepare_adjacency(edge_index, num_nodes, n_pad)   # bf16, padded

    out = gconv_forward(a_hat, x, prep)
    out = jax.block_until_ready(out)

    ref = reference_forward(x, edge_index, gconv_params, mlp_params)

    assert out.shape == (num_nodes, num_classes), out.shape
    assert jnp.all(jnp.isfinite(out))
    max_err = float(jnp.max(jnp.abs(out - ref)))
    assert max_err < 5e-2, f"max abs error vs reference: {max_err}"
    print("KERNEL_OK")
</pallas_src>

<mosaic_0001>
module attributes {stable_mosaic.version = 11 : i64} {
  func.func @kernel(%arg0: i32, %arg1: i32, %arg2: i32, %arg3: memref<128x128xbf16, #tpu.memory_space<vmem>>, %arg4: memref<128x128xf32, #tpu.memory_space<vmem>>, %arg5: memref<1x128x128xf32, #tpu.memory_space<vmem>>, %arg6: memref<1x1x128xf32, #tpu.memory_space<vmem>>, %arg7: memref<256x128xf32, #tpu.memory_space<vmem>>, %arg8: memref<1x128xf32, #tpu.memory_space<vmem>>, %arg9: memref<128x128xf32, #tpu.memory_space<vmem>>, %arg10: memref<1x128xf32, #tpu.memory_space<vmem>>, %arg11: memref<128x128xf32, #tpu.memory_space<vmem>>, %arg12: memref<128x128xbf16, #tpu.memory_space<vmem>>, %arg13: memref<128x128xf32, #tpu.memory_space<vmem>>, %arg14: memref<128x128xf32, #tpu.memory_space<vmem>>, %arg15: memref<128x128xf32, #tpu.memory_space<vmem>>) attributes {dimension_semantics = [#tpu.dimension_semantics<arbitrary>, #tpu.dimension_semantics<arbitrary>, #tpu.dimension_semantics<arbitrary>], iteration_bounds = array<i64: 2, 1, 1>, scalar_prefetch = 0 : i64, scratch_operands = 4 : i64, tpu.core_type = #tpu.core_type<tc>, window_params = [{transform_indices = @transform_0, window_bounds = array<i64: 128, 128>}, {pipeline_mode = #tpu.pipeline_mode<synchronous>, transform_indices = @transform_1, window_bounds = array<i64: 128, 128>}, {transform_indices = @transform_2, window_bounds = array<i64: 1, 128, 128>}, {transform_indices = @transform_3, window_bounds = array<i64: 1, 1, 128>}, {pipeline_mode = #tpu.pipeline_mode<synchronous>, transform_indices = @transform_4, window_bounds = array<i64: 256, 128>}, {pipeline_mode = #tpu.pipeline_mode<synchronous>, transform_indices = @transform_5, window_bounds = array<i64: 1, 128>}, {pipeline_mode = #tpu.pipeline_mode<synchronous>, transform_indices = @transform_6, window_bounds = array<i64: 128, 128>}, {pipeline_mode = #tpu.pipeline_mode<synchronous>, transform_indices = @transform_7, window_bounds = array<i64: 1, 128>}, {pipeline_mode = #tpu.pipeline_mode<synchronous>, transform_indices = @transform_8, window_bounds = array<i64: 128, 128>}]} {
    %c0_i32 = arith.constant 0 : i32
    %0 = arith.cmpi eq, %arg1, %c0_i32 : i32
    %c0_i32_0 = arith.constant 0 : i32
    %1 = arith.cmpi eq, %arg2, %c0_i32_0 : i32
    %2 = arith.andi %0, %1 : i1
    %3 = arith.extui %2 : i1 to i32
    %c0_i32_1 = arith.constant 0 : i32
    %4 = arith.cmpi ne, %3, %c0_i32_1 : i32
    scf.if %4 {
      %c0_15 = arith.constant 0 : index
      %c0_16 = arith.constant 0 : index
      %c0_17 = arith.constant 0 : index
      %27 = vector.load %arg5[%c0_15, %c0_16, %c0_17] : memref<1x128x128xf32, #tpu.memory_space<vmem>>, vector<1x128x128xf32>
      %28 = vector.shape_cast %27 : vector<1x128x128xf32> to vector<128x128xf32>
      %c0_i32_18 = arith.constant 0 : i32
      %29 = arith.cmpi eq, %arg0, %c0_i32_18 : i32
      %30 = arith.extui %29 : i1 to i32
      %c0_i32_19 = arith.constant 0 : i32
      %31 = arith.cmpi ne, %30, %c0_i32_19 : i32
      scf.if %31 {
        %c0_22 = arith.constant 0 : index
        %c0_23 = arith.constant 0 : index
        %35 = vector.load %arg4[%c0_22, %c0_23] : memref<128x128xf32, #tpu.memory_space<vmem>>, vector<128x128xf32>
        %cst_24 = arith.constant dense<0.000000e+00> : vector<128x128xf32>
        %36 = tpu.matmul %35, %28, %cst_24 {dimension_numbers = #tpu.dot_dimension_numbers<[1], [0], [0], [1], [0, 0, 1, 1], [], []>} : vector<128x128xf32>, vector<128x128xf32>, vector<128x128xf32> -> vector<128x128xf32>
        %37 = arith.truncf %36 : vector<128x128xf32> to vector<128x128xbf16>
        %c0_25 = arith.constant 0 : index
        %c0_26 = arith.constant 0 : index
        %38 = vector.load %arg12[%c0_25, %c0_26] : memref<128x128xbf16, #tpu.memory_space<vmem>>, vector<128x128xbf16>
        tpu.vector_store %arg12[%c0_25, %c0_26], %37 {strides = array<i32>} : memref<128x128xbf16, #tpu.memory_space<vmem>>, vector<128x128xbf16>,
      } else {
      }
      %c1_i32_20 = arith.constant 1 : i32
      %32 = arith.cmpi eq, %arg0, %c1_i32_20 : i32
      %33 = arith.extui %32 : i1 to i32
      %c0_i32_21 = arith.constant 0 : i32
      %34 = arith.cmpi ne, %33, %c0_i32_21 : i32
      scf.if %34 {
        %c0_22 = arith.constant 0 : index
        %c0_23 = arith.constant 0 : index
        %35 = vector.load %arg14[%c0_22, %c0_23] : memref<128x128xf32, #tpu.memory_space<vmem>>, vector<128x128xf32>
        %cst_24 = arith.constant dense<0.000000e+00> : vector<128x128xf32>
        %36 = tpu.matmul %35, %28, %cst_24 {dimension_numbers = #tpu.dot_dimension_numbers<[1], [0], [0], [1], [0, 0, 1, 1], [], []>} : vector<128x128xf32>, vector<128x128xf32>, vector<128x128xf32> -> vector<128x128xf32>
        %37 = arith.truncf %36 : vector<128x128xf32> to vector<128x128xbf16>
        %c0_25 = arith.constant 0 : index
        %c0_26 = arith.constant 0 : index
        %38 = vector.load %arg12[%c0_25, %c0_26] : memref<128x128xbf16, #tpu.memory_space<vmem>>, vector<128x128xbf16>
        tpu.vector_store %arg12[%c0_25, %c0_26], %37 {strides = array<i32>} : memref<128x128xbf16, #tpu.memory_space<vmem>>, vector<128x128xbf16>,
      } else {
      }
    } else {
    }
    %c0_i32_2 = arith.constant 0 : i32
    %5 = arith.cmpi eq, %arg2, %c0_i32_2 : i32
    %6 = arith.extui %5 : i1 to i32
    %c0_i32_3 = arith.constant 0 : i32
    %7 = arith.cmpi ne, %6, %c0_i32_3 : i32
    scf.if %7 {
      %cst_15 = arith.constant 0.000000e+00 : f32
      %27 = vector.broadcast %cst_15 : f32 to vector<128x128xf32>
      %c0_16 = arith.constant 0 : index
      %c0_17 = arith.constant 0 : index
      %28 = vector.load %arg13[%c0_16, %c0_17] : memref<128x128xf32, #tpu.memory_space<vmem>>, vector<128x128xf32>
      tpu.vector_store %arg13[%c0_16, %c0_17], %27 {strides = array<i32>} : memref<128x128xf32, #tpu.memory_space<vmem>>, vector<128x128xf32>,
    } else {
    }
    %c128_i32 = arith.constant 128 : i32
    %8 = arith.muli %arg2, %c128_i32 : i32
    %9 = tpu.assume_multiple %8, 128 : i32
    %c0 = arith.constant 0 : index
    %c0_4 = arith.constant 0 : index
    %10 = vector.load %arg13[%c0, %c0_4] : memref<128x128xf32, #tpu.memory_space<vmem>>, vector<128x128xf32>
    %c0_5 = arith.constant 0 : index
    %c0_6 = arith.constant 0 : index
    %11 = vector.load %arg3[%c0_5, %c0_6] : memref<128x128xbf16, #tpu.memory_space<vmem>>, vector<128x128xbf16>
    %12 = arith.index_cast %9 : i32 to index
    %c0_7 = arith.constant 0 : index
    %13 = vector.load %arg12[%12, %c0_7] : memref<128x128xbf16, #tpu.memory_space<vmem>>, vector<128x128xbf16>
    %cst = arith.constant dense<0.000000e+00> : vector<128x128xf32>
    %14 = tpu.matmul %11, %13, %cst {dimension_numbers = #tpu.dot_dimension_numbers<[1], [0], [0], [1], [0, 0, 1, 1], [], []>} : vector<128x128xbf16>, vector<128x128xbf16>, vector<128x128xf32> -> vector<128x128xf32>
    %15 = arith.addf %10, %14 : vector<128x128xf32>
    %c0_8 = arith.constant 0 : index
    %c0_9 = arith.constant 0 : index
    %16 = vector.load %arg13[%c0_8, %c0_9] : memref<128x128xf32, #tpu.memory_space<vmem>>, vector<128x128xf32>
    tpu.vector_store %arg13[%c0_8, %c0_9], %15 {strides = array<i32>} : memref<128x128xf32, #tpu.memory_space<vmem>>, vector<128x128xf32>,
    %c0_i32_10 = arith.constant 0 : i32
    %17 = arith.cmpi eq, %arg2, %c0_i32_10 : i32
    %18 = arith.extui %17 : i1 to i32
    %c0_i32_11 = arith.constant 0 : i32
    %19 = arith.cmpi ne, %18, %c0_i32_11 : i32
    scf.if %19 {
      %c0_15 = arith.constant 0 : index
      %c0_16 = arith.constant 0 : index
      %27 = vector.load %arg13[%c0_15, %c0_16] : memref<128x128xf32, #tpu.memory_space<vmem>>, vector<128x128xf32>
      %c0_17 = arith.constant 0 : index
      %c0_18 = arith.constant 0 : index
      %c0_19 = arith.constant 0 : index
      %28 = vector.load %arg6[%c0_17, %c0_18, %c0_19] : memref<1x1x128xf32, #tpu.memory_space<vmem>>, vector<1x1x128xf32>
      %29 = vector.shape_cast %28 : vector<1x1x128xf32> to vector<1x128xf32>
      %30 = vector.broadcast %29 : vector<1x128xf32> to vector<128x128xf32>
      %31 = arith.addf %27, %30 : vector<128x128xf32>
      %cst_20 = arith.constant 0.000000e+00 : f32
      %32 = vector.broadcast %cst_20 : f32 to vector<128x128xf32>
      %33 = arith.maximumf %31, %32 : vector<128x128xf32>
      %c128_i32_21 = arith.constant 128 : i32
      %34 = arith.muli %arg1, %c128_i32_21 : i32
      %35 = tpu.assume_multiple %34, 128 : i32
      %c0_i32_22 = arith.constant 0 : i32
      %36 = arith.cmpi eq, %arg0, %c0_i32_22 : i32
      %37 = arith.extui %36 : i1 to i32
      %c0_i32_23 = arith.constant 0 : i32
      %38 = arith.cmpi ne, %37, %c0_i32_23 : i32
      scf.if %38 {
        %42 = arith.index_cast %35 : i32 to index
        %c0_26 = arith.constant 0 : index
        %43 = vector.load %arg14[%42, %c0_26] : memref<128x128xf32, #tpu.memory_space<vmem>>, vector<128x128xf32>
        tpu.vector_store %arg14[%42, %c0_26], %33 {strides = array<i32>} : memref<128x128xf32, #tpu.memory_space<vmem>>, vector<128x128xf32>,
      } else {
      }
      %c1_i32_24 = arith.constant 1 : i32
      %39 = arith.cmpi eq, %arg0, %c1_i32_24 : i32
      %40 = arith.extui %39 : i1 to i32
      %c0_i32_25 = arith.constant 0 : i32
      %41 = arith.cmpi ne, %40, %c0_i32_25 : i32
      scf.if %41 {
        %42 = arith.index_cast %35 : i32 to index
        %c0_26 = arith.constant 0 : index
        %43 = vector.load %arg15[%42, %c0_26] : memref<128x128xf32, #tpu.memory_space<vmem>>, vector<128x128xf32>
        tpu.vector_store %arg15[%42, %c0_26], %33 {strides = array<i32>} : memref<128x128xf32, #tpu.memory_space<vmem>>, vector<128x128xf32>,
      } else {
      }
    } else {
    }
    %c1_i32 = arith.constant 1 : i32
    %20 = arith.cmpi eq, %arg0, %c1_i32 : i32
    %c0_i32_12 = arith.constant 0 : i32
    %21 = arith.cmpi eq, %arg1, %c0_i32_12 : i32
    %c0_i32_13 = arith.constant 0 : i32
    %22 = arith.cmpi eq, %arg2, %c0_i32_13 : i32
    %23 = arith.andi %21, %22 : i1
    %24 = arith.andi %20, %23 : i1
    %25 = arith.extui %24 : i1 to i32
    %c0_i32_14 = arith.constant 0 : i32
    %26 = arith.cmpi ne, %25, %c0_i32_14 : i32
    scf.if %26 {
      %c0_15 = arith.constant 0 : index
      %c0_16 = arith.constant 0 : index
      %27 = vector.load %arg14[%c0_15, %c0_16] : memref<128x128xf32, #tpu.memory_space<vmem>>, vector<128x128xf32>
      %c0_17 = arith.constant 0 : index
      %c0_18 = arith.constant 0 : index
      %28 = vector.load %arg7[%c0_17, %c0_18] : memref<256x128xf32, #tpu.memory_space<vmem>>, vector<128x128xf32>
      %cst_19 = arith.constant dense<0.000000e+00> : vector<128x128xf32>
      %29 = tpu.matmul %27, %28, %cst_19 {dimension_numbers = #tpu.dot_dimension_numbers<[1], [0], [0], [1], [0, 0, 1, 1], [], []>} : vector<128x128xf32>, vector<128x128xf32>, vector<128x128xf32> -> vector<128x128xf32>
      %c0_20 = arith.constant 0 : index
      %c0_21 = arith.constant 0 : index
      %30 = vector.load %arg15[%c0_20, %c0_21] : memref<128x128xf32, #tpu.memory_space<vmem>>, vector<128x128xf32>
      %c128 = arith.constant 128 : index
      %c0_22 = arith.constant 0 : index
      %31 = vector.load %arg7[%c128, %c0_22] : memref<256x128xf32, #tpu.memory_space<vmem>>, vector<128x128xf32>
      %cst_23 = arith.constant dense<0.000000e+00> : vector<128x128xf32>
      %32 = tpu.matmul %30, %31, %cst_23 {dimension_numbers = #tpu.dot_dimension_numbers<[1], [0], [0], [1], [0, 0, 1, 1], [], []>} : vector<128x128xf32>, vector<128x128xf32>, vector<128x128xf32> -> vector<128x128xf32>
      %33 = arith.addf %29, %32 : vector<128x128xf32>
      %c0_24 = arith.constant 0 : index
      %c0_25 = arith.constant 0 : index
      %34 = vector.load %arg8[%c0_24, %c0_25] : memref<1x128xf32, #tpu.memory_space<vmem>>, vector<1x128xf32>
      %35 = vector.broadcast %34 : vector<1x128xf32> to vector<128x128xf32>
      %36 = arith.addf %33, %35 : vector<128x128xf32>
      %cst_26 = arith.constant 0.000000e+00 : f32
      %37 = vector.broadcast %cst_26 : f32 to vector<128x128xf32>
      %38 = arith.maximumf %36, %37 : vector<128x128xf32>
      %c0_27 = arith.constant 0 : index
      %c0_28 = arith.constant 0 : index
      %39 = vector.load %arg9[%c0_27, %c0_28] : memref<128x128xf32, #tpu.memory_space<vmem>>, vector<128x128xf32>
      %cst_29 = arith.constant dense<0.000000e+00> : vector<128x128xf32>
      %40 = tpu.matmul %38, %39, %cst_29 {dimension_numbers = #tpu.dot_dimension_numbers<[1], [0], [0], [1], [0, 0, 1, 1], [], []>} : vector<128x128xf32>, vector<128x128xf32>, vector<128x128xf32> -> vector<128x128xf32>
      %c0_30 = arith.constant 0 : index
      %c0_31 = arith.constant 0 : index
      %41 = vector.load %arg10[%c0_30, %c0_31] : memref<1x128xf32, #tpu.memory_space<vmem>>, vector<1x128xf32>
      %42 = vector.broadcast %41 : vector<1x128xf32> to vector<128x128xf32>
      %43 = arith.addf %40, %42 : vector<128x128xf32>
      %c0_32 = arith.constant 0 : index
      %c0_33 = arith.constant 0 : index
      %44 = vector.load %arg11[%c0_32, %c0_33] : memref<128x128xf32, #tpu.memory_space<vmem>>, vector<128x128xf32>
      tpu.vector_store %arg11[%c0_32, %c0_33], %43 {strides = array<i32>} : memref<128x128xf32, #tpu.memory_space<vmem>>, vector<128x128xf32>,
    } else {
    }
    return
  }
  func.func @transform_0(%arg0: i32, %arg1: i32, %arg2: i32) -> (i32, i32) {
    %c0_i32 = arith.constant 0 : i32
    return %arg1, %arg2 : i32, i32
  }
  func.func @transform_1(%arg0: i32, %arg1: i32, %arg2: i32) -> (i32, i32) {
    %c0_i32 = arith.constant 0 : i32
    %c0_i32_0 = arith.constant 0 : i32
    %c0_i32_1 = arith.constant 0 : i32
    return %c0_i32, %c0_i32_0 : i32, i32
  }
  func.func @transform_2(%arg0: i32, %arg1: i32, %arg2: i32) -> (i32, i32, i32) {
    %c0_i32 = arith.constant 0 : i32
    %c0_i32_0 = arith.constant 0 : i32
    %c0_i32_1 = arith.constant 0 : i32
    return %arg0, %c0_i32, %c0_i32_0 : i32, i32, i32
  }
  func.func @transform_3(%arg0: i32, %arg1: i32, %arg2: i32) -> (i32, i32, i32) {
    %c0_i32 = arith.constant 0 : i32
    %c0_i32_0 = arith.constant 0 : i32
    %c0_i32_1 = arith.constant 0 : i32
    return %arg0, %c0_i32, %c0_i32_0 : i32, i32, i32
  }
  func.func @transform_4(%arg0: i32, %arg1: i32, %arg2: i32) -> (i32, i32) {
    %c0_i32 = arith.constant 0 : i32
    %c0_i32_0 = arith.constant 0 : i32
    %c0_i32_1 = arith.constant 0 : i32
    return %c0_i32, %c0_i32_0 : i32, i32
  }
  func.func @transform_5(%arg0: i32, %arg1: i32, %arg2: i32) -> (i32, i32) {
    %c0_i32 = arith.constant 0 : i32
    %c0_i32_0 = arith.constant 0 : i32
    %c0_i32_1 = arith.constant 0 : i32
    return %c0_i32, %c0_i32_0 : i32, i32
  }
  func.func @transform_6(%arg0: i32, %arg1: i32, %arg2: i32) -> (i32, i32) {
    %c0_i32 = arith.constant 0 : i32
    %c0_i32_0 = arith.constant 0 : i32
    %c0_i32_1 = arith.constant 0 : i32
    return %c0_i32, %c0_i32_0 : i32, i32
  }
  func.func @transform_7(%arg0: i32, %arg1: i32, %arg2: i32) -> (i32, i32) {
    %c0_i32 = arith.constant 0 : i32
    %c0_i32_0 = arith.constant 0 : i32
    %c0_i32_1 = arith.constant 0 : i32
    return %c0_i32, %c0_i32_0 : i32, i32
  }
  func.func @transform_8(%arg0: i32, %arg1: i32, %arg2: i32) -> (i32, i32) {
    %c0_i32 = arith.constant 0 : i32
    %c0_i32_0 = arith.constant 0 : i32
    %c0_i32_1 = arith.constant 0 : i32
    return %c0_i32, %c0_i32_0 : i32, i32
  }
}

</mosaic_0001>

<bundles_post_ra>
// kernel: tpu_custom_call.1
= control target key start
LH: loop header
LB: loop body
LE: loop exit
PB: predicated region body
PF: predicated region fallthrough
CT: control target
= control target key end

     0   :  { %s3654_s0 = inlined_call_operand.hbm [shape: bf16[128,128], index: 0, kind: input, shape index: {}]   ;;  %s3655_s1 = inlined_call_operand.hbm [shape: f32[128,128], index: 1, kind: input, shape index: {}]   ;;  %s3656_s2 = inlined_call_operand.hbm [shape: f32[2,128,128], index: 2, kind: input, shape index: {}]   ;;  %s3657_s3 = inlined_call_operand.vmem [shape: f32[2,1,128], index: 3, kind: input, shape index: {}]   ;;  %s3658_s4 = inlined_call_operand.hbm [shape: f32[256,128], index: 4, kind: input, shape index: {}]   ;;  %s3659_s5 = inlined_call_operand.vmem [shape: f32[1,128], index: 5, kind: input, shape index: {}]   ;;  %s3660_s6 = inlined_call_operand.hbm [shape: f32[128,128], index: 6, kind: input, shape index: {}]   ;;  %s3661_s7 = inlined_call_operand.vmem [shape: f32[1,128], index: 7, kind: input, shape index: {}]   ;;  %s3662_s8 = inlined_call_operand.hbm [shape: f32[128,128], index: 8, kind: output, shape index: {}]  }
   0x1   :  { %3666 = sst [smem:[#allocation22_spill]] %s3654_s0 }
   0x2   :  { %13 = vsyncpa [#allocation7], 0 }
   0x3   :  { %14 = vsyncpa [#allocation10], 0 }
   0x4   :  { %15 = vsyncpa [#allocation14], 0 }
   0x5   :  { %16 = vsyncpa [#allocation8], 0  ;;  %s3248_s27 = smov 0   ;;  %s3250_s28 = smov 0  }
   0x6   :  { %s3252_s29 = smov 0   ;;  %s3254_s30 = smov 0  }
   0x7   :  { %s3256_s9 = smov 0   ;;  %s3258_s10 = smov 0  }
   0x8 LB: > { %s3277_s11 = sadd.s32 4294967295, %s3189_s10   ;;  %p110_p0 = scmp.ne.s32.totalorder %s3173_s28, %s3169_s27  ;;  %s3189_s10 = sphi %s3258_s10, %s22_s10   ;;  %s3185_s9 = sphi %s3256_s9, %s3686_s9   ;;  %s3181_s30 = sphi %s3254_s30, %s3685_s30   ;;  %s3177_s29 = sphi %s3252_s29, %s3684_s29   ;;  %s3173_s28 = sphi %s3250_s28, %s3683_s28   ;;  %s3169_s27 = sphi %s3248_s27, %s3682_s27  }
   0x9   : > { %p3663_p1 = scmp.eq.s32.totalorder %s3277_s11, 0  ;;  %p2035_p2 = scmp.ge.s32.totalorder %s3189_s10, 1 }
   0xa   : > { %p252_p3 = scmp.lt.s32.totalorder %s3189_s10, 3  ;;  %s3191_s14 = smov [#allocation6]  }
   0xb   : > { %p3285_p4 = por %p3663_p1, %p110_p0  ;;  %s268_s15 = sshll.u32 %s3191_s14, 4  ;;  %s269_s15 = int_to_ptr.vmem [resolvable:$true] %s268_s15 }
   0xc   : > { %p3289_p5 = pnand %p2035_p2, %p252_p3  ;;  %s3192_s17 = smov [#allocation9]  }
   0xd   : > { %s281_s18 = sshll.u32 %s3192_s17, 4  ;;  %s2974_s19 = scalar_lea.vmem %s269_s15, 1024  ;;  %s282_s18 = int_to_ptr.vmem [resolvable:$true] %s281_s18 }
   0xe   : > { %p2860_p6 = pneg %p3289_p5  ;;  %p2975_p9 = scmp.ne.s32.totalorder %s269_s15, %s2974_s19 }
   0xf   : > { %p2982_p12 = scmp.lt.s32.totalorder %s269_s15, %s269_s15  ;;  %p2983_p13 = scmp.lt.s32.totalorder %s2974_s19, %s2974_s19 }
  0x10   : > { %p3297_p7 = pnand %p2860_p6, %p3663_p1 }
  0x11   : > { %p2984_p0 = por %p2983_p13, %p2982_p12 }
  0x12   : > { %p2965_p8 = pneg %p3297_p7 }
  0x14   : > { %p2977_p10 = pnand %p2975_p9, %p2965_p8 }
  0x16   : > { %p2978_p11 = pneg %p2977_p10 }
  0x18   : > { %p2985_p2 = pnand %p2984_p0, %p2978_p11 }
  0x1a   : > { %2988 = shalt.err (!%p2985_p2)
}
  0x1b   : > { %s3193_s20 = smov 64   ;;  %s3194_s21 = smov 4  }
  0x1c   : > { %s3670_s0 = sld [smem:[#allocation22_spill]]  ;;  %s3000_s24 = scalar_lea.vmem %s282_s18, 2048 }
  0x1d   : > { %p3001_p3 = scmp.ne.s32.totalorder %s282_s18, %s3000_s24  ;;  %p3008_p10 = scmp.lt.s32.totalorder %s282_s18, %s282_s18 }
  0x1e   : > { %p3009_p1 = scmp.lt.s32.totalorder %s3000_s24, %s3000_s24 }
  0x1f   : > { %p3003_p6 = pnand %p3001_p3, %p2965_p8 }
  0x20   : > { %p3010_p12 = por %p3009_p1, %p3008_p10 }
  0x21   : > { %p3004_p9 = pneg %p3003_p6 }
  0x22   : > { %2863 = dma.hbm_to_vmem [thread:$0]  (!%p3297_p7), %s3670_s0, 1024, %s269_s15, [#allocation7], %s3193_s20, %s3193_s20, %s3194_s21  }
  0x23   : > { %p3011_p11 = pnand %p3010_p12, %p3004_p9 }
  0x25   : > { %3014 = shalt.err (!%p3011_p11)
}
  0x26   : > { %s3664_s25 = smov 128   ;;  %s3665_s26 = smov 8  }
  0x27   : > { %2866 = dma.hbm_to_vmem [thread:$0]  (!%p3297_p7), %s3655_s1, 2048, %s282_s18, [#allocation10], %s3664_s25, %s3664_s25, %s3665_s26  }
  0x28   : > { %s3197_s15 = smov [#allocation12]   ;;  %s3198_s19 = smov [#allocation13]  }
  0x29   : > { %s294_s17 = sshll.u32 %s3197_s15, 4  ;;  %s310_s20 = sshll.u32 %s3198_s19, 4  ;;  %s295_s17 = int_to_ptr.vmem [resolvable:$true] %s294_s17  ;;  %s311_s20 = int_to_ptr.vmem [resolvable:$true] %s310_s20 }
  0x2a   : > { %s3026_s21 = scalar_lea.vmem %s295_s17, 4096  ;;  %p3034_p2 = scmp.lt.s32.totalorder %s295_s17, %s295_s17 }
  0x2b   : > { %p3027_p1 = scmp.ne.s32.totalorder %s295_s17, %s3026_s21  ;;  %p3035_p3 = scmp.lt.s32.totalorder %s3026_s21, %s3026_s21 }
  0x2d   : > { %p3029_p13 = pnand %p3027_p1, %p2965_p8  ;;  %p3036_p6 = por %p3035_p3, %p3034_p2 }
  0x2f   : > { %p3030_p0 = pneg %p3029_p13 }
  0x31   : > { %p3037_p9 = pnand %p3036_p6, %p3030_p0 }
  0x33   : > { %3040 = shalt.err (!%p3037_p9)
}
  0x34   : > { %2869 = dma.hbm_to_vmem [thread:$0]  (!%p3297_p7), %s3658_s4, 4096, %s295_s17, [#allocation10], %s3664_s25, %s3664_s25, %s3665_s26  }
  0x35   : > { %s3052_s23 = scalar_lea.vmem %s311_s20, 2048  ;;  %p3060_p1 = scmp.lt.s32.totalorder %s311_s20, %s311_s20 }
  0x36   : > { %p3053_p10 = scmp.ne.s32.totalorder %s311_s20, %s3052_s23  ;;  %p3061_p13 = scmp.lt.s32.totalorder %s3052_s23, %s3052_s23 }
  0x38   : > { %p3055_p12 = pnand %p3053_p10, %p2965_p8  ;;  %p3062_p0 = por %p3061_p13, %p3060_p1 }
  0x3a   : > { %p3056_p11 = pneg %p3055_p12 }
  0x3c   : > { %p3063_p2 = pnand %p3062_p0, %p3056_p11 }
  0x3e   : > { %3066 = shalt.err (!%p3063_p2)
}
  0x3f   : > { %2872 = dma.hbm_to_vmem [thread:$0]  (!%p3297_p7), %s3660_s6, 2048, %s311_s20, [#allocation14], %s3664_s25, %s3664_s25, %s3665_s26  }
  0x40   : > { %s41_s14 = sadd.s32 1, %s3185_s9  ;;  %s97_s16 = sadd.s32 1, %s3177_s29 }
  0x41   : > { %p43_p8 = scmp.ge.s32.totalorder %s41_s14, 2  ;;  %p104_p3 = scmp.ne.s32.totalorder %s3177_s29, %s3173_s28 }
  0x42   : > { %p105_p6 = scmp.eq.s32.totalorder %s3189_s10, 0  ;;  %p2881_p9 = scmp.lt.s32.totalorder %s3189_s10, 2 }
  0x43   : > { %s3688_s14 = smov (%p43_p8, %s41_s14), 0  ;;  %s327_s15 = sand.u32 1, %s3189_s10  }
  0x44   : > { %p106_p10 = por %p105_p6, %p104_p3  ;;  %s94_s17 = ssub.s32 %s3185_s9, %s3688_s14 }
  0x45   : > { %p95_p12 = scmp.eq.s32.totalorder %s94_s17, 0  ;;  %s329_s19 = sand.u32 1, %s3177_s29  }
  0x46   : > { %s2041_s21 = sshll.u32 %s329_s19, 7  ;;  %s2110_s18 = sshll.u32 %s3185_s9, 11 }
  0x47   : > { %s3358_s22 = scalar_select %p95_p12, %s3177_s29, %s97_s16  }
  0x48   : > { %s337_s24 = scalar_lea.hbm %s3656_s2, %s2110_s18  ;;  %s331_s27 = scalar_lea.vmem [#allocation11], %s2041_s21 }
  0x49   : > { %s338_s25 = sshll.u32 %s331_s27, 4  ;;  %p3365_p7 = pnand %p2881_p9, %p106_p10  ;;  %s339_s25 = int_to_ptr.vmem [resolvable:$true] %s338_s25 }
  0x4a   : > { %s328_s0 = scalar_lea.sflag [#allocation7], %s327_s15  ;;  %s3080_s17 = scalar_lea.vmem %s339_s25, 2048 }
  0x4b   : > { %p3069_p11 = pneg %p3365_p7  ;;  %p3081_p1 = scmp.ne.s32.totalorder %s339_s25, %s3080_s17 }
  0x4c   : > { %s3199_s16 = smov [#allocation11]  }
  0x4d   : > { %p3083_p13 = pnand %p3081_p1, %p3069_p11  ;;  %s3085_s19 = sshll.u32 %s3199_s16, 4  ;;  %s3086_s19 = int_to_ptr.vmem [resolvable:$false] %s3085_s19 }
  0x4e   : > { %s3087_s18 = scalar_lea.vmem %s3086_s19, 4096  ;;  %p3088_p2 = scmp.lt.s32.totalorder %s339_s25, %s3086_s19 }
  0x4f   : > { %p3084_p0 = pneg %p3083_p13  ;;  %p3089_p8 = scmp.lt.s32.totalorder %s3087_s18, %s3080_s17 }
  0x51   : > { %p3090_p3 = por %p3089_p8, %p3088_p2 }
  0x53   : > { %p3091_p6 = pnand %p3090_p3, %p3084_p0 }
  0x55   : > { %3094 = shalt.err (!%p3091_p6)
}
  0x56   : > { %s3672_s21 = smov 8   ;;  %s3673_s20 = smov 128  }
  0x57   : > { %2876 = dma.hbm_to_vmem [thread:$0]  (!%p3365_p7), %s337_s24, 2048, %s339_s25, %s328_s0, %s3673_s20, %s3673_s20, %s3672_s21  }
  0x58   : > { %356 = sbr.rel (%p3289_p5) target bundleno = 1358 (0x54e), region = 52  ;;  %p3674_p9 = scmp.eq.s32.totalorder (!%p3289_p5), %s3277_s11, 0 }
  0x5d   : > { %3144 = dma.done.wait (%p3674_p9), [#allocation7], 1024   ;;  %p3675_p10 = pmov %p3674_p9 }
  0x5e   : > { %p3676_p12 = pmov %p3674_p9 }
  0x5f   : > { %3146 = vsyncadd (%p3675_p10), [#allocation7], 4294966272 }
  0x60   : > { %3148 = dma.done.wait (%p3676_p12), [#allocation10], 2048   ;;  %p3677_p11 = pmov %p3674_p9 }
  0x61   : > { %s366_s26 = sand.u32 1, %s3277_s11   ;;  %s368_s0 = sand.u32 1, %s3173_s28  }
  0x62   : > { %3150 = vsyncadd (%p3677_p11), [#allocation10], 4294965248  ;;  %s2047_s25 = sshll.u32 %s368_s0, 7  ;;  %s367_s13 = scalar_lea.sflag [#allocation7], %s366_s26 }
  0x63   : > { %s370_s15 = scalar_lea.vmem [#allocation11], %s2047_s25 }
  0x64   : > { %3152 = dma.done.wait (%p3285_p4), %s367_s13, 2048  }
  0x65   : > { %3154 = vsyncadd (%p3285_p4), %s367_s13, 4294965248  ;;  %p3678_p5 = pmov %p3674_p9 }
  0x67   : > { %3156 = dma.done.wait (%p3678_p5), [#allocation10], 4096   ;;  %p3679_p7 = pmov %p3678_p5 }
  0x68   : > { %p3680_p1 = pmov %p3678_p5 }
  0x69   : > { %3158 = vsyncadd (%p3679_p7), [#allocation10], 4294963200 }
  0x6a   : > { %3160 = dma.done.wait (%p3680_p1), [#allocation14], 2048   ;;  %p3681_p13 = pmov %p3680_p1 }
  0x6b   : > { %p410_p0 = scmp.lt.s32.totalorder %s3181_s30, 1  ;;  %v3408_v0 = vld [vmem:[%s370_s15] sm:$0xff]  ;;  %v3410_v1 = vld [vmem:[%s370_s15 + $0x8] sm:$0xff]  ;;  %v3412_v2 = vld [vmem:[%s370_s15 + $0x10] sm:$0xff]  ;;  %p2050_p4 = scmp.ne.s32.totalorder %s3181_s30, 0 }
  0x6c   : > { %3162 = vsyncadd (%p3681_p13), [#allocation14], 4294965248  ;;  %v3414_v3 = vld [vmem:[%s370_s15 + $0x18] sm:$0xff]  ;;  %v3416_v4 = vld [vmem:[%s370_s15 + $0x20] sm:$0xff] }
  0x6d   : > { %s3402_s23 = scalar_select %p410_p0, %s3181_s30, 1  ;;  %v3418_v5 = vld [vmem:[%s370_s15 + $0x28] sm:$0xff]  ;;  %v3420_v6 = vld [vmem:[%s370_s15 + $0x30] sm:$0xff]  ;;  %v3422_v7 = vld [vmem:[%s370_s15 + $0x38] sm:$0xff] }
  0x6e   : > { %v3424_v8 = vld [vmem:[%s370_s15 + $0x40] sm:$0xff]  ;;  %v3426_v9 = vld [vmem:[%s370_s15 + $0x48] sm:$0xff]  ;;  %v3428_v10 = vld [vmem:[%s370_s15 + $0x50] sm:$0xff]  ;;  %439 = sbr.rel (%p2050_p4) target bundleno = 358 (0x166), region = 80 }
  0x6f   : > { %s412_s27 = scalar_lea.vmem %s3657_s3, %s3402_s23  ;;  %v3430_v11 = vld [vmem:[%s370_s15 + $0x58] sm:$0xff]  ;;  %v3432_v12 = vld [vmem:[%s370_s15 + $0x60] sm:$0xff]  ;;  %v3434_v13 = vld [vmem:[%s370_s15 + $0x68] sm:$0xff] }
  0x70   : > { %v3436_v14 = vld [vmem:[%s370_s15 + $0x70] sm:$0xff]  ;;  %v3438_v15 = vld [vmem:[%s370_s15 + $0x78] sm:$0xff] }
  0x73   : > { %2414 = vmatprep.subr.mxu0 %v3438_v15  ;;  %2726 = vmatprep.subr.mxu1 %v3438_v15  ;;  %v440_v16 = vld [vmem:[#allocation9] sm:$0xff]  ;;  %v441_v18 = vld [vmem:[#allocation9 + $0x8] sm:$0xff]  ;;  %v442_v20 = vld [vmem:[#allocation9 + $0x10] sm:$0xff] }
  0x74   : > { %2415 = vmatpush3.msra.mxu0 %v3438_v15  ;;  %2742 = vmatpush3.msra.mxu1 %v3438_v15  ;;  %v448_v17 = vld [vmem:[#allocation9 + $0x40] sm:$0xff]  ;;  %v449_v19 = vld [vmem:[#allocation9 + $0x48] sm:$0xff]  ;;  %v450_v21 = vld [vmem:[#allocation9 + $0x50] sm:$0xff] }
  0x75   : > { %2416 = vmatprep.subr.mxu0 %v3436_v14  ;;  %2727 = vmatprep.subr.mxu1 %v3436_v14  ;;  %v443_v22 = vld [vmem:[#allocation9 + $0x18] sm:$0xff]  ;;  %v444_v24 = vld [vmem:[#allocation9 + $0x20] sm:$0xff]  ;;  %v445_v26 = vld [vmem:[#allocation9 + $0x28] sm:$0xff] }
  0x76   : > { %2417 = vmatpush3.msra.mxu0 %v3436_v14  ;;  %2743 = vmatpush3.msra.mxu1 %v3436_v14  ;;  %v451_v23 = vld [vmem:[#allocation9 + $0x58] sm:$0xff]  ;;  %v452_v25 = vld [vmem:[#allocation9 + $0x60] sm:$0xff]  ;;  %v453_v27 = vld [vmem:[#allocation9 + $0x68] sm:$0xff] }
  0x77   : > { %2418 = vmatprep.subr.mxu0 %v3434_v13  ;;  %2728 = vmatprep.subr.mxu1 %v3434_v13  ;;  %v446_v28 = vld [vmem:[#allocation9 + $0x30] sm:$0xff]  ;;  %v447_v30 = vld [vmem:[#allocation9 + $0x38] sm:$0xff] }
  0x78   : > { %2419 = vmatpush3.msra.mxu0 %v3434_v13  ;;  %2744 = vmatpush3.msra.mxu1 %v3434_v13  ;;  %v454_v29 = vld [vmem:[#allocation9 + $0x70] sm:$0xff]  ;;  %v455_v31 = vld [vmem:[#allocation9 + $0x78] sm:$0xff] }
  0x79   : > { %2420 = vmatprep.subr.mxu0 %v3432_v12  ;;  %2729 = vmatprep.subr.mxu1 %v3432_v12 }
  0x7a   : > { %2421 = vmatpush3.msra.mxu0 %v3432_v12  ;;  %2745 = vmatpush3.msra.mxu1 %v3432_v12 }
  0x7b   : > { %2422 = vmatprep.subr.mxu0 %v3430_v11  ;;  %2730 = vmatprep.subr.mxu1 %v3430_v11 }
  0x7c   : > { %2423 = vmatpush3.msra.mxu0 %v3430_v11  ;;  %2746 = vmatpush3.msra.mxu1 %v3430_v11 }
  0x7d   : > { %2424 = vmatprep.subr.mxu0 %v3428_v10  ;;  %2731 = vmatprep.subr.mxu1 %v3428_v10 }
  0x7e   : > { %2425 = vmatpush3.msra.mxu0 %v3428_v10  ;;  %2747 = vmatpush3.msra.mxu1 %v3428_v10 }
  0x7f   : > { %2426 = vmatprep.subr.mxu0 %v3426_v9  ;;  %2732 = vmatprep.subr.mxu1 %v3426_v9 }
  0x80   : > { %2427 = vmatpush3.msra.mxu0 %v3426_v9  ;;  %2748 = vmatpush3.msra.mxu1 %v3426_v9 }
  0x81   : > { %2428 = vmatprep.subr.mxu0 %v3424_v8  ;;  %2733 = vmatprep.subr.mxu1 %v3424_v8 }
  0x82   : > { %2429 = vmatpush3.msra.mxu0 %v3424_v8  ;;  %2749 = vmatpush3.msra.mxu1 %v3424_v8 }
  0x83   : > { %2430 = vmatprep.subr.mxu0 %v3422_v7  ;;  %2734 = vmatprep.subr.mxu1 %v3422_v7 }
  0x84   : > { %2431 = vmatpush3.msra.mxu0 %v3422_v7  ;;  %2750 = vmatpush3.msra.mxu1 %v3422_v7 }
  0x85   : > { %2432 = vmatprep.subr.mxu0 %v3420_v6  ;;  %2735 = vmatprep.subr.mxu1 %v3420_v6 }
  0x86   : > { %2433 = vmatpush3.msra.mxu0 %v3420_v6  ;;  %2751 = vmatpush3.msra.mxu1 %v3420_v6 }
  0x87   : > { %2434 = vmatprep.subr.mxu0 %v3418_v5  ;;  %2736 = vmatprep.subr.mxu1 %v3418_v5 }
  0x88   : > { %2435 = vmatpush3.msra.mxu0 %v3418_v5  ;;  %2752 = vmatpush3.msra.mxu1 %v3418_v5 }
  0x89   : > { %2436 = vmatprep.subr.mxu0 %v3416_v4  ;;  %2737 = vmatprep.subr.mxu1 %v3416_v4 }
  0x8a   : > { %2437 = vmatpush3.msra.mxu0 %v3416_v4  ;;  %2753 = vmatpush3.msra.mxu1 %v3416_v4 }
  0x8b   : > { %2438 = vmatprep.subr.mxu0 %v3414_v3  ;;  %2738 = vmatprep.subr.mxu1 %v3414_v3 }
  0x8c   : > { %2439 = vmatpush3.msra.mxu0 %v3414_v3  ;;  %2754 = vmatpush3.msra.mxu1 %v3414_v3 }
  0x8d   : > { %2440 = vmatprep.subr.mxu0 %v3412_v2  ;;  %2739 = vmatprep.subr.mxu1 %v3412_v2 }
  0x8e   : > { %2441 = vmatpush3.msra.mxu0 %v3412_v2  ;;  %2755 = vmatpush3.msra.mxu1 %v3412_v2 }
  0x8f   : > { %2442 = vmatprep.subr.mxu0 %v3410_v1  ;;  %2740 = vmatprep.subr.mxu1 %v3410_v1 }
  0x90   : > { %2443 = vmatpush3.msra.mxu0 %v3410_v1  ;;  %2756 = vmatpush3.msra.mxu1 %v3410_v1 }
  0x91   : > { %2444 = vmatprep.subr.mxu0 %v3408_v0  ;;  %2741 = vmatprep.subr.mxu1 %v3408_v0 }
  0x92   : > { %2445 = vmatpush3.msra.mxu0 %v3408_v0  ;;  %2757 = vmatpush3.msra.mxu1 %v3408_v0 }
  0x93   : > { %2446 = vmatprep.mubr.f32.mxu0 %v440_v16  ;;  %2458 = vmatprep.mubr.f32.mxu1 %v448_v17 }
  0x94   : > { %2447 = vmatmul.mubr.f32.vlgmr.msra.gmra.mxu0 %v441_v18  ;;  %2459 = vmatmul.mubr.f32.vlgmr.msra.gmra.mxu1 %v449_v19 }
  0x95   : > { %2449 = vmatprep.mubr.f32.mxu0 %v442_v20  ;;  %2461 = vmatprep.mubr.f32.mxu1 %v450_v21 }
  0x98   : > { %2450 = vmatmul.mubr.f32.gmra.mxu0 %v443_v22  ;;  %2462 = vmatmul.mubr.f32.gmra.mxu1 %v451_v23 }
  0x99   : > { %2452 = vmatprep.mubr.f32.mxu0 %v444_v24  ;;  %2464 = vmatprep.mubr.f32.mxu1 %v452_v25 }
  0x9c   : > { %2453 = vmatmul.mubr.f32.gmra.mxu0 %v445_v26  ;;  %2465 = vmatmul.mubr.f32.gmra.mxu1 %v453_v27 }
  0x9d   : > { %2455 = vmatprep.mubr.f32.mxu0 %v446_v28  ;;  %2467 = vmatprep.mubr.f32.mxu1 %v454_v29 }
  0xa0   : > { %2456 = vmatmul.mubr.f32.gmra.mxu0 %v447_v30  ;;  %2468 = vmatmul.mubr.f32.gmra.mxu1 %v455_v31 }
 0x154   : > { %v2448_v32 = vpop.f32.mrf.mxu0  ;;  %v2460_v33 = vpop.f32.mrf.mxu1 }
 0x156   : > { %v522_v34 = vpop.f32.mrf.mxu0  ;;  %v562_v35 = vpop.f32.mrf.mxu1 }
 0x157   : > { %v2147_v36 = vpack.c.bf16 %v2448_v32, %v522_v34  ;;  %v2167_v37 = vpack.c.bf16 %v2460_v33, %v562_v35 }
 0x158   : > { %v2451_v38 = vpop.f32.mrf.mxu0  ;;  %v2463_v39 = vpop.f32.mrf.mxu1 }
 0x159   : > { %2148 = vst [vmem:[#allocation2] sm:$0xff] %v2147_v36   ;;  %2227 = vst [vmem:[#allocation2 + $0x20] sm:$0xff] %v2167_v37  }
 0x15a   : > { %v532_v40 = vpop.f32.mrf.mxu0  ;;  %v572_v41 = vpop.f32.mrf.mxu1 }
 0x15b   : > { %v2152_v42 = vpack.c.bf16 %v2451_v38, %v532_v40  ;;  %v2172_v43 = vpack.c.bf16 %v2463_v39, %v572_v41 }
 0x15c   : > { %v2454_v44 = vpop.f32.mrf.mxu0  ;;  %v2466_v45 = vpop.f32.mrf.mxu1 }
 0x15d   : > { %2224 = vst [vmem:[#allocation2 + $0x8] sm:$0xff] %v2152_v42   ;;  %2228 = vst [vmem:[#allocation2 + $0x28] sm:$0xff] %v2172_v43  }
 0x15e   : > { %v542_v46 = vpop.f32.mrf.mxu0  ;;  %v582_v47 = vpop.f32.mrf.mxu1 }
 0x15f   : > { %v2157_v48 = vpack.c.bf16 %v2454_v44, %v542_v46  ;;  %v2177_v49 = vpack.c.bf16 %v2466_v45, %v582_v47 }
 0x160   : > { %v2457_v50 = vpop.f32.mrf.mxu0  ;;  %v2469_v51 = vpop.f32.mrf.mxu1 }
 0x161   : > { %2225 = vst [vmem:[#allocation2 + $0x10] sm:$0xff] %v2157_v48   ;;  %2229 = vst [vmem:[#allocation2 + $0x30] sm:$0xff] %v2177_v49  }
 0x162   : > { %v552_v52 = vpop.f32.mrf.mxu0  ;;  %v592_v53 = vpop.f32.mrf.mxu1 }
 0x163   : > { %v2162_v54 = vpack.c.bf16 %v2457_v50, %v552_v52  ;;  %v2182_v55 = vpack.c.bf16 %v2469_v51, %v592_v53 }
 0x165   : > { %2226 = vst [vmem:[#allocation2 + $0x18] sm:$0xff] %v2162_v54   ;;  %2230 = vst [vmem:[#allocation2 + $0x38] sm:$0xff] %v2182_v55  }
 0x166 PF: > { %p2067_p2 = scmp.ne.s32.totalorder %s3181_s30, 1 }
 0x168   : > { %684 = sbr.rel (%p2067_p2) target bundleno = 608 (0x260), region = 84 }
 0x16d   : > { %2470 = vmatprep.subr.mxu0 %v3438_v15  ;;  %2758 = vmatprep.subr.mxu1 %v3438_v15  ;;  %v685_v56 = vld [vmem:[#allocation4 + $0x30] sm:$0xff]  ;;  %v693_v57 = vld [vmem:[#allocation4 + $0x40] sm:$0xff]  ;;  %v687_v60 = vld [vmem:[#allocation4 + $0x58] sm:$0xff] }
 0x16e   : > { %2471 = vmatpush3.msra.mxu0 %v3438_v15  ;;  %2774 = vmatpush3.msra.mxu1 %v3438_v15  ;;  %v686_v58 = vld [vmem:[#allocation4] sm:$0xff]  ;;  %v695_v61 = vld [vmem:[#allocation4 + $0x10] sm:$0xff]  ;;  %v688_v62 = vld [vmem:[#allocation4 + $0x18] sm:$0xff] }
 0x16f   : > { %2472 = vmatprep.subr.mxu0 %v3436_v14  ;;  %2759 = vmatprep.subr.mxu1 %v3436_v14  ;;  %v694_v59 = vld [vmem:[#allocation4 + $0x20] sm:$0xff]  ;;  %v696_v63 = vld [vmem:[#allocation4 + $0x38] sm:$0xff] }
 0x170   : > { %2473 = vmatpush3.msra.mxu0 %v3436_v14  ;;  %2775 = vmatpush3.msra.mxu1 %v3436_v14 }
 0x171   : > { %2474 = vmatprep.subr.mxu0 %v3434_v13  ;;  %2760 = vmatprep.subr.mxu1 %v3434_v13 }
 0x172   : > { %2475 = vmatpush3.msra.mxu0 %v3434_v13  ;;  %2776 = vmatpush3.msra.mxu1 %v3434_v13 }
 0x173   : > { %2476 = vmatprep.subr.mxu0 %v3432_v12  ;;  %2761 = vmatprep.subr.mxu1 %v3432_v12 }
 0x174   : > { %2477 = vmatpush3.msra.mxu0 %v3432_v12  ;;  %2777 = vmatpush3.msra.mxu1 %v3432_v12 }
 0x175   : > { %2478 = vmatprep.subr.mxu0 %v3430_v11  ;;  %2762 = vmatprep.subr.mxu1 %v3430_v11 }
 0x176   : > { %2479 = vmatpush3.msra.mxu0 %v3430_v11  ;;  %2778 = vmatpush3.msra.mxu1 %v3430_v11 }
 0x177   : > { %2480 = vmatprep.subr.mxu0 %v3428_v10  ;;  %2763 = vmatprep.subr.mxu1 %v3428_v10 }
 0x178   : > { %2481 = vmatpush3.msra.mxu0 %v3428_v10  ;;  %2779 = vmatpush3.msra.mxu1 %v3428_v10 }
 0x179   : > { %2482 = vmatprep.subr.mxu0 %v3426_v9  ;;  %2764 = vmatprep.subr.mxu1 %v3426_v9 }
 0x17a   : > { %2483 = vmatpush3.msra.mxu0 %v3426_v9  ;;  %2780 = vmatpush3.msra.mxu1 %v3426_v9 }
 0x17b   : > { %2484 = vmatprep.subr.mxu0 %v3424_v8  ;;  %2765 = vmatprep.subr.mxu1 %v3424_v8 }
 0x17c   : > { %2485 = vmatpush3.msra.mxu0 %v3424_v8  ;;  %2781 = vmatpush3.msra.mxu1 %v3424_v8 }
 0x17d   : > { %2486 = vmatprep.subr.mxu0 %v3422_v7  ;;  %2766 = vmatprep.subr.mxu1 %v3422_v7 }
 0x17e   : > { %2487 = vmatpush3.msra.mxu0 %v3422_v7  ;;  %2782 = vmatpush3.msra.mxu1 %v3422_v7  ;;  %v700_v7 = vld [vmem:[#allocation4 + $0x28] sm:$0xff] }
 0x17f   : > { %2488 = vmatprep.subr.mxu0 %v3420_v6  ;;  %2767 = vmatprep.subr.mxu1 %v3420_v6 }
 0x180   : > { %2489 = vmatpush3.msra.mxu0 %v3420_v6  ;;  %2783 = vmatpush3.msra.mxu1 %v3420_v6  ;;  %v692_v6 = vld [vmem:[#allocation4 + $0x48] sm:$0xff] }
 0x181   : > { %2490 = vmatprep.subr.mxu0 %v3418_v5  ;;  %2768 = vmatprep.subr.mxu1 %v3418_v5 }
 0x182   : > { %2491 = vmatpush3.msra.mxu0 %v3418_v5  ;;  %2784 = vmatpush3.msra.mxu1 %v3418_v5  ;;  %v691_v5 = vld [vmem:[#allocation4 + $0x8] sm:$0xff] }
 0x183   : > { %2492 = vmatprep.subr.mxu0 %v3416_v4  ;;  %2769 = vmatprep.subr.mxu1 %v3416_v4 }
 0x184   : > { %2493 = vmatpush3.msra.mxu0 %v3416_v4  ;;  %2785 = vmatpush3.msra.mxu1 %v3416_v4  ;;  %v698_v4 = vld [vmem:[#allocation4 + $0x70] sm:$0xff] }
 0x185   : > { %2494 = vmatprep.subr.mxu0 %v3414_v3  ;;  %2770 = vmatprep.subr.mxu1 %v3414_v3 }
 0x186   : > { %2495 = vmatpush3.msra.mxu0 %v3414_v3  ;;  %2786 = vmatpush3.msra.mxu1 %v3414_v3  ;;  %v690_v3 = vld [vmem:[#allocation4 + $0x68] sm:$0xff] }
 0x187   : > { %2496 = vmatprep.subr.mxu0 %v3412_v2  ;;  %2771 = vmatprep.subr.mxu1 %v3412_v2 }
 0x188   : > { %2497 = vmatpush3.msra.mxu0 %v3412_v2  ;;  %2787 = vmatpush3.msra.mxu1 %v3412_v2  ;;  %v697_v2 = vld [vmem:[#allocation4 + $0x60] sm:$0xff] }
 0x189   : > { %2498 = vmatprep.subr.mxu0 %v3410_v1  ;;  %2772 = vmatprep.subr.mxu1 %v3410_v1 }
 0x18a   : > { %2499 = vmatpush3.msra.mxu0 %v3410_v1  ;;  %2788 = vmatpush3.msra.mxu1 %v3410_v1  ;;  %v689_v1 = vld [vmem:[#allocation4 + $0x50] sm:$0xff] }
 0x18b   : > { %2500 = vmatprep.subr.mxu0 %v3408_v0  ;;  %2773 = vmatprep.subr.mxu1 %v3408_v0 }
 0x18c   : > { %2501 = vmatpush3.msra.mxu0 %v3408_v0  ;;  %2789 = vmatpush3.msra.mxu1 %v3408_v0  ;;  %v699_v0 = vld [vmem:[#allocation4 + $0x78] sm:$0xff] }
 0x18d   : > { %2502 = vmatprep.mubr.f32.mxu0 %v685_v56  ;;  %2514 = vmatprep.mubr.f32.mxu1 %v693_v57 }
 0x18e   : > { %2503 = vmatmul.mubr.f32.vlgmr.msra.gmra.mxu0 %v686_v58  ;;  %2515 = vmatmul.mubr.f32.vlgmr.msra.gmra.mxu1 %v694_v59 }
 0x18f   : > { %2505 = vmatprep.mubr.f32.mxu0 %v687_v60  ;;  %2517 = vmatprep.mubr.f32.mxu1 %v695_v61 }
 0x192   : > { %2506 = vmatmul.mubr.f32.gmra.mxu0 %v688_v62  ;;  %2518 = vmatmul.mubr.f32.gmra.mxu1 %v696_v63 }
 0x193   : > { %2508 = vmatprep.mubr.f32.mxu0 %v689_v1  ;;  %2520 = vmatprep.mubr.f32.mxu1 %v697_v2 }
 0x196   : > { %2509 = vmatmul.mubr.f32.gmra.mxu0 %v690_v3  ;;  %2521 = vmatmul.mubr.f32.gmra.mxu1 %v698_v4 }
 0x197   : > { %2511 = vmatprep.mubr.f32.mxu0 %v691_v5  ;;  %2523 = vmatprep.mubr.f32.mxu1 %v699_v0 }
 0x19a   : > { %2512 = vmatmul.mubr.f32.gmra.mxu0 %v692_v6  ;;  %2524 = vmatmul.mubr.f32.gmra.mxu1 %v700_v7 }
 0x24e   : > { %v2504_v8 = vpop.f32.mrf.mxu0  ;;  %v2516_v9 = vpop.f32.mrf.mxu1 }
 0x250   : > { %v767_v10 = vpop.f32.mrf.mxu0  ;;  %v807_v11 = vpop.f32.mrf.mxu1 }
 0x251   : > { %v2187_v12 = vpack.c.bf16 %v2504_v8, %v767_v10  ;;  %v2207_v13 = vpack.c.bf16 %v2516_v9, %v807_v11 }
 0x252   : > { %v2507_v14 = vpop.f32.mrf.mxu0  ;;  %v2519_v15 = vpop.f32.mrf.mxu1 }
 0x253   : > { %2188 = vst [vmem:[#allocation2] sm:$0xff] %v2187_v12   ;;  %2234 = vst [vmem:[#allocation2 + $0x20] sm:$0xff] %v2207_v13  }
 0x254   : > { %v777_v16 = vpop.f32.mrf.mxu0  ;;  %v817_v17 = vpop.f32.mrf.mxu1 }
 0x255   : > { %v2192_v18 = vpack.c.bf16 %v2507_v14, %v777_v16  ;;  %v2212_v19 = vpack.c.bf16 %v2519_v15, %v817_v17 }
 0x256   : > { %v2510_v20 = vpop.f32.mrf.mxu0  ;;  %v2522_v21 = vpop.f32.mrf.mxu1 }
 0x257   : > { %2231 = vst [vmem:[#allocation2 + $0x8] sm:$0xff] %v2192_v18   ;;  %2235 = vst [vmem:[#allocation2 + $0x28] sm:$0xff] %v2212_v19  }
 0x258   : > { %v787_v22 = vpop.f32.mrf.mxu0  ;;  %v827_v23 = vpop.f32.mrf.mxu1 }
 0x259   : > { %v2197_v24 = vpack.c.bf16 %v2510_v20, %v787_v22  ;;  %v2217_v25 = vpack.c.bf16 %v2522_v21, %v827_v23 }
 0x25a   : > { %v2513_v26 = vpop.f32.mrf.mxu0  ;;  %v2525_v27 = vpop.f32.mrf.mxu1 }
 0x25b   : > { %2232 = vst [vmem:[#allocation2 + $0x10] sm:$0xff] %v2197_v24   ;;  %2236 = vst [vmem:[#allocation2 + $0x30] sm:$0xff] %v2217_v25  }
 0x25c   : > { %v797_v28 = vpop.f32.mrf.mxu0  ;;  %v837_v29 = vpop.f32.mrf.mxu1 }
 0x25d   : > { %v2202_v30 = vpack.c.bf16 %v2513_v26, %v797_v28  ;;  %v2222_v31 = vpack.c.bf16 %v2525_v27, %v837_v29 }
 0x25f   : > { %2233 = vst [vmem:[#allocation2 + $0x18] sm:$0xff] %v2202_v30   ;;  %2237 = vst [vmem:[#allocation2 + $0x38] sm:$0xff] %v2222_v31  }
 0x260 PF: > { %v2949_v34 = vld [vmem:[#allocation2 + $0x28] sm:$0xff]   ;;  %v2950_v35 = vld [vmem:[#allocation2 + $0x20] sm:$0xff]   ;;  %v2959_v44 = vld [vmem:[#allocation6 + $0x10] sm:$0xff]  }
 0x261   : > { %v2955_v36 = vld [vmem:[#allocation6] sm:$0xff]   ;;  %v2953_v40 = vld [vmem:[#allocation2 + $0x8] sm:$0xff]   ;;  %v2960_v45 = vld [vmem:[#allocation6 + $0x30] sm:$0xff]  }
 0x262   : > { %v2948_v33 = vld [vmem:[#allocation2 + $0x30] sm:$0xff]   ;;  %v2956_v37 = vld [vmem:[#allocation6 + $0x20] sm:$0xff]   ;;  %2542 = vmatprep.mubr.bf16.mxu0 %v2955_v36  ;;  %v2957_v42 = vld [vmem:[#allocation6 + $0x8] sm:$0xff]  }
 0x263   : > { %2550 = vmatprep.mubr.bf16.mxu1 %v2956_v37  ;;  %v2952_v39 = vld [vmem:[#allocation2 + $0x10] sm:$0xff]   ;;  %v2954_v41 = vld [vmem:[#allocation2] sm:$0xff]   ;;  %v2958_v43 = vld [vmem:[#allocation6 + $0x28] sm:$0xff]  }
 0x264   : > { %v2961_v46 = vld [vmem:[#allocation6 + $0x18] sm:$0xff]   ;;  %v2100_v48 = vld [vmem:[%s412_s27] ss:$0 sm:$0xff] }
 0x265   : > { %v2962_v47 = vld [vmem:[#allocation6 + $0x38] sm:$0xff]  }
 0x266   : > { %v2947_v32 = vld [vmem:[#allocation2 + $0x38] sm:$0xff]  }
 0x267   : > { %2526 = vmatprep.subr.bf16.mxu0 %v2947_v32  ;;  %2790 = vmatprep.subr.bf16.mxu1 %v2947_v32  ;;  %v2951_v38 = vld [vmem:[#allocation2 + $0x18] sm:$0xff]  }
 0x268   : > { %2527 = vmatpush3.bf16.msra.mxu0 %v2947_v32  ;;  %2798 = vmatpush3.bf16.msra.mxu1 %v2947_v32 }
 0x269   : > { %2528 = vmatprep.subr.bf16.mxu0 %v2948_v33  ;;  %2791 = vmatprep.subr.bf16.mxu1 %v2948_v33 }
 0x26c   : > { %2529 = vmatpush3.bf16.msra.mxu0 %v2948_v33  ;;  %2799 = vmatpush3.bf16.msra.mxu1 %v2948_v33 }
 0x26d   : > { %2530 = vmatprep.subr.bf16.mxu0 %v2949_v34  ;;  %2792 = vmatprep.subr.bf16.mxu1 %v2949_v34 }
 0x270   : > { %2531 = vmatpush3.bf16.msra.mxu0 %v2949_v34  ;;  %2800 = vmatpush3.bf16.msra.mxu1 %v2949_v34 }
 0x271   : > { %2532 = vmatprep.subr.bf16.mxu0 %v2950_v35  ;;  %2793 = vmatprep.subr.bf16.mxu1 %v2950_v35 }
 0x274   : > { %2533 = vmatpush3.bf16.msra.mxu0 %v2950_v35  ;;  %2801 = vmatpush3.bf16.msra.mxu1 %v2950_v35 }
 0x275   : > { %2534 = vmatprep.subr.bf16.mxu0 %v2951_v38  ;;  %2794 = vmatprep.subr.bf16.mxu1 %v2951_v38 }
 0x278   : > { %2535 = vmatpush3.bf16.msra.mxu0 %v2951_v38  ;;  %2802 = vmatpush3.bf16.msra.mxu1 %v2951_v38 }
 0x279   : > { %2536 = vmatprep.subr.bf16.mxu0 %v2952_v39  ;;  %2795 = vmatprep.subr.bf16.mxu1 %v2952_v39 }
 0x27c   : > { %2537 = vmatpush3.bf16.msra.mxu0 %v2952_v39  ;;  %2803 = vmatpush3.bf16.msra.mxu1 %v2952_v39 }
 0x27d   : > { %2538 = vmatprep.subr.bf16.mxu0 %v2953_v40  ;;  %2796 = vmatprep.subr.bf16.mxu1 %v2953_v40 }
 0x280   : > { %2539 = vmatpush3.bf16.msra.mxu0 %v2953_v40  ;;  %2804 = vmatpush3.bf16.msra.mxu1 %v2953_v40 }
 0x281   : > { %2540 = vmatprep.subr.bf16.mxu0 %v2954_v41  ;;  %2797 = vmatprep.subr.bf16.mxu1 %v2954_v41 }
 0x284   : > { %2541 = vmatpush3.bf16.msra.mxu0 %v2954_v41  ;;  %2805 = vmatpush3.bf16.msra.mxu1 %v2954_v41 }
 0x287   : > { %2543 = vmatmul.mubr.bf16.vlgmr.msra.gmra.mxu0 %v2957_v42  ;;  %2551 = vmatmul.mubr.bf16.vlgmr.msra.gmra.mxu1 %v2958_v43 }
 0x288   : > { %2546 = vmatprep.mubr.bf16.mxu0 %v2959_v44  ;;  %2554 = vmatprep.mubr.bf16.mxu1 %v2960_v45 }
 0x28f   : > { %2547 = vmatmul.mubr.bf16.gmra.mxu0 %v2961_v46  ;;  %2555 = vmatmul.mubr.bf16.gmra.mxu1 %v2962_v47 }
 0x347   : > { %v2544_v49 = vpop.f32.mrf.mxu0  ;;  %v2552_v50 = vpop.f32.mrf.mxu1 }
 0x348   : > { %v3579_v51 = vadd.f32 %v2544_v49, %v2100_v48  ;;  %v3581_v52 = vadd.f32 %v2552_v50, %v2100_v48 }
 0x349   : > { %v1128_v53 = vpop.f32.mrf.mxu0  ;;  %v1160_v54 = vpop.f32.mrf.mxu1 }
 0x34a   : > { %v1267_v55 = vmax.f32 %v3579_v51, 0.0  ;;  %v1275_v56 = vmax.f32 %v3581_v52, 0.0  ;;  %v1249_v57 = vadd.f32 %v2100_v48, %v1128_v53  ;;  %v3585_v58 = vadd.f32 %v2100_v48, %v1160_v54 }
 0x34b   : > { %v2545_v59 = vpop.f32.mrf.mxu0  ;;  %v2553_v60 = vpop.f32.mrf.mxu1 }
 0x34c   : > { %v1265_v61 = vmax.f32 %v1249_v57, 0.0  ;;  %v1273_v62 = vmax.f32 %v3585_v58, 0.0  ;;  %v1252_v63 = vadd.f32 %v2545_v59, %v2100_v48  ;;  %v3588_v1 = vadd.f32 %v2553_v60, %v2100_v48 }
 0x34d   : > { %v1131_v2 = vpop.f32.mrf.mxu0  ;;  %v1163_v3 = vpop.f32.mrf.mxu1 }
 0x34e   : > { %v1268_v4 = vmax.f32 %v1252_v63, 0.0  ;;  %v1276_v5 = vmax.f32 %v3588_v1, 0.0  ;;  %v1250_v0 = vadd.f32 %v2100_v48, %v1131_v2  ;;  %v1258_v6 = vadd.f32 %v2100_v48, %v1163_v3 }
 0x34f   : > { %v2548_v7 = vpop.f32.mrf.mxu0  ;;  %v2556_v8 = vpop.f32.mrf.mxu1 }
 0x350   : > { %v1266_v9 = vmax.f32 %v1250_v0, 0.0  ;;  %v1274_v10 = vmax.f32 %v1258_v6, 0.0  ;;  %v1255_v11 = vadd.f32 %v2548_v7, %v2100_v48  ;;  %v1263_v12 = vadd.f32 %v2556_v8, %v2100_v48 }
 0x351   : > { %v1144_v13 = vpop.f32.mrf.mxu0  ;;  %v1176_v14 = vpop.f32.mrf.mxu1 }
 0x352   : > { %v1271_v15 = vmax.f32 %v1255_v11, 0.0  ;;  %v1279_v16 = vmax.f32 %v1263_v12, 0.0  ;;  %v1253_v17 = vadd.f32 %v2100_v48, %v1144_v13  ;;  %v1261_v18 = vadd.f32 %v2100_v48, %v1176_v14 }
 0x353   : > { %v2549_v19 = vpop.f32.mrf.mxu0  ;;  %v2557_v20 = vpop.f32.mrf.mxu1 }
 0x354   : > { %v1269_v21 = vmax.f32 %v1253_v17, 0.0  ;;  %v1277_v22 = vmax.f32 %v1261_v18, 0.0  ;;  %v1256_v23 = vadd.f32 %v2549_v19, %v2100_v48  ;;  %v1264_v24 = vadd.f32 %v2557_v20, %v2100_v48  ;;  %1285 = sbr.rel (%p2050_p4) target bundleno = 865 (0x361), region = 96 }
 0x355   : > { %v1147_v25 = vpop.f32.mrf.mxu0  ;;  %v1179_v26 = vpop.f32.mrf.mxu1 }
 0x356   : > { %v1272_v27 = vmax.f32 %v1256_v23, 0.0  ;;  %v1280_v28 = vmax.f32 %v1264_v24, 0.0  ;;  %v1254_v29 = vadd.f32 %v2100_v48, %v1147_v25  ;;  %v1262_v30 = vadd.f32 %v2100_v48, %v1179_v26 }
 0x358   : > { %v1270_v31 = vmax.f32 %v1254_v29, 0.0  ;;  %v1278_v32 = vmax.f32 %v1262_v30, 0.0 }
 0x359   : > { %1287 = vst [vmem:[#allocation4 + $0x30] sm:$0xff] %v1265_v61  ;;  %1288 = vst [vmem:[#allocation4] sm:$0xff] %v1266_v9 }
 0x35a   : > { %1289 = vst [vmem:[#allocation4 + $0x58] sm:$0xff] %v1267_v55  ;;  %1290 = vst [vmem:[#allocation4 + $0x18] sm:$0xff] %v1268_v4 }
 0x35b   : > { %1291 = vst [vmem:[#allocation4 + $0x50] sm:$0xff] %v1269_v21  ;;  %1292 = vst [vmem:[#allocation4 + $0x68] sm:$0xff] %v1270_v31 }
 0x35c   : > { %1293 = vst [vmem:[#allocation4 + $0x8] sm:$0xff] %v1271_v15  ;;  %1294 = vst [vmem:[#allocation4 + $0x48] sm:$0xff] %v1272_v27 }
 0x35d   : > { %1295 = vst [vmem:[#allocation4 + $0x40] sm:$0xff] %v1273_v62  ;;  %1296 = vst [vmem:[#allocation4 + $0x20] sm:$0xff] %v1274_v10 }
 0x35e   : > { %1297 = vst [vmem:[#allocation4 + $0x10] sm:$0xff] %v1275_v56  ;;  %1298 = vst [vmem:[#allocation4 + $0x38] sm:$0xff] %v1276_v5 }
 0x35f   : > { %1299 = vst [vmem:[#allocation4 + $0x60] sm:$0xff] %v1277_v22  ;;  %1300 = vst [vmem:[#allocation4 + $0x70] sm:$0xff] %v1278_v32 }
 0x360   : > { %1301 = vst [vmem:[#allocation4 + $0x78] sm:$0xff] %v1279_v16  ;;  %1302 = vst [vmem:[#allocation4 + $0x28] sm:$0xff] %v1280_v28 }
 0x361 PF: > { %1306 = sbr.rel (%p2067_p2) target bundleno = 878 (0x36e), region = 100 }
 0x366   : > { %1308 = vst [vmem:[#allocation5 + $0x28] sm:$0xff] %v1265_v61  ;;  %1309 = vst [vmem:[#allocation5 + $0x68] sm:$0xff] %v1266_v9 }
 0x367   : > { %1310 = vst [vmem:[#allocation5 + $0x10] sm:$0xff] %v1267_v55  ;;  %1311 = vst [vmem:[#allocation5 + $0x40] sm:$0xff] %v1268_v4 }
 0x368   : > { %1312 = vst [vmem:[#allocation5 + $0x48] sm:$0xff] %v1269_v21  ;;  %1313 = vst [vmem:[#allocation5 + $0x30] sm:$0xff] %v1270_v31 }
 0x369   : > { %1314 = vst [vmem:[#allocation5 + $0x70] sm:$0xff] %v1271_v15  ;;  %1315 = vst [vmem:[#allocation5 + $0x38] sm:$0xff] %v1272_v27 }
 0x36a   : > { %1316 = vst [vmem:[#allocation5 + $0x20] sm:$0xff] %v1273_v62  ;;  %1317 = vst [vmem:[#allocation5 + $0x78] sm:$0xff] %v1274_v10 }
 0x36b   : > { %1318 = vst [vmem:[#allocation5 + $0x18] sm:$0xff] %v1275_v56  ;;  %1319 = vst [vmem:[#allocation5 + $0x58] sm:$0xff] %v1276_v5 }
 0x36c   : > { %1320 = vst [vmem:[#allocation5] sm:$0xff] %v1277_v22  ;;  %1321 = vst [vmem:[#allocation5 + $0x8] sm:$0xff] %v1278_v32 }
 0x36d   : > { %1322 = vst [vmem:[#allocation5 + $0x60] sm:$0xff] %v1279_v16  ;;  %1323 = vst [vmem:[#allocation5 + $0x50] sm:$0xff] %v1280_v28 }
 0x36e PF: > { %p1324_p8 = scmp.eq.s32.totalorder %s3181_s30, 1 }
 0x36f   : > { %v1392_v33 = vld [vmem:[#allocation12 + $0xf8] sm:$0xff] (%p1324_p8)  ;;  %v1391_v35 = vld [vmem:[#allocation12 + $0xf0] sm:$0xff] (%p1324_p8)  ;;  %v1390_v37 = vld [vmem:[#allocation12 + $0xe8] sm:$0xff] (%p1324_p8) }
 0x370   : > { %1328 = sbr.rel (!%p1324_p8) target bundleno = 1342 (0x53e), region = 104  ;;  %v1360_v34 = vld [vmem:[#allocation12 + $0x78] sm:$0xff] (%p1324_p8)  ;;  %2558 = vmatprep.subr.mxu0 (%p1324_p8), %v1392_v33  ;;  %v1359_v36 = vld [vmem:[#allocation12 + $0x70] sm:$0xff] (%p1324_p8)  ;;  %v1358_v38 = vld [vmem:[#allocation12 + $0x68] sm:$0xff] (%p1324_p8) }
 0x371   : > { %2614 = vmatprep.subr.mxu1 (%p1324_p8), %v1360_v34  ;;  %2559 = vmatpush3.msra.mxu0 (%p1324_p8), %v1392_v33  ;;  %v1389_v39 = vld [vmem:[#allocation12 + $0xe0] sm:$0xff] (%p1324_p8)  ;;  %v1388_v41 = vld [vmem:[#allocation12 + $0xd8] sm:$0xff] (%p1324_p8)  ;;  %v1387_v43 = vld [vmem:[#allocation12 + $0xd0] sm:$0xff] (%p1324_p8) }
 0x372   : > { %2615 = vmatpush3.msra.mxu1 (%p1324_p8), %v1360_v34  ;;  %2560 = vmatprep.subr.mxu0 (%p1324_p8), %v1391_v35  ;;  %v1357_v40 = vld [vmem:[#allocation12 + $0x60] sm:$0xff] (%p1324_p8)  ;;  %v1356_v42 = vld [vmem:[#allocation12 + $0x58] sm:$0xff] (%p1324_p8)  ;;  %v1355_v44 = vld [vmem:[#allocation12 + $0x50] sm:$0xff] (%p1324_p8) }
 0x373   : > { %2616 = vmatprep.subr.mxu1 (%p1324_p8), %v1359_v36  ;;  %2561 = vmatpush3.msra.mxu0 (%p1324_p8), %v1391_v35  ;;  %v1386_v45 = vld [vmem:[#allocation12 + $0xc8] sm:$0xff] (%p1324_p8)  ;;  %v1385_v47 = vld [vmem:[#allocation12 + $0xc0] sm:$0xff] (%p1324_p8)  ;;  %v1384_v49 = vld [vmem:[#allocation12 + $0xb8] sm:$0xff] (%p1324_p8) }
 0x374   : > { %2617 = vmatpush3.msra.mxu1 (%p1324_p8), %v1359_v36  ;;  %2562 = vmatprep.subr.mxu0 (%p1324_p8), %v1390_v37  ;;  %v1354_v46 = vld [vmem:[#allocation12 + $0x48] sm:$0xff] (%p1324_p8)  ;;  %v1353_v48 = vld [vmem:[#allocation12 + $0x40] sm:$0xff] (%p1324_p8)  ;;  %v1352_v50 = vld [vmem:[#allocation12 + $0x38] sm:$0xff] (%p1324_p8) }
 0x375   : > { %2618 = vmatprep.subr.mxu1 %v1358_v38  ;;  %2563 = vmatpush3.msra.mxu0 %v1390_v37  ;;  %v1383_v51 = vld [vmem:[#allocation12 + $0xb0] sm:$0xff]  ;;  %v1382_v53 = vld [vmem:[#allocation12 + $0xa8] sm:$0xff]  ;;  %v1381_v55 = vld [vmem:[#allocation12 + $0xa0] sm:$0xff] }
 0x376   : > { %2619 = vmatpush3.msra.mxu1 %v1358_v38  ;;  %2564 = vmatprep.subr.mxu0 %v1389_v39  ;;  %v1351_v52 = vld [vmem:[#allocation12 + $0x30] sm:$0xff]  ;;  %v1350_v54 = vld [vmem:[#allocation12 + $0x28] sm:$0xff]  ;;  %v1349_v56 = vld [vmem:[#allocation12 + $0x20] sm:$0xff] }
 0x377   : > { %2620 = vmatprep.subr.mxu1 %v1357_v40  ;;  %2565 = vmatpush3.msra.mxu0 %v1389_v39  ;;  %v1380_v57 = vld [vmem:[#allocation12 + $0x98] sm:$0xff]  ;;  %v1379_v59 = vld [vmem:[#allocation12 + $0x90] sm:$0xff]  ;;  %v1378_v61 = vld [vmem:[#allocation12 + $0x88] sm:$0xff] }
 0x378   : > { %2621 = vmatpush3.msra.mxu1 %v1357_v40  ;;  %2566 = vmatprep.subr.mxu0 %v1388_v41  ;;  %v1348_v58 = vld [vmem:[#allocation12 + $0x18] sm:$0xff]  ;;  %v1347_v60 = vld [vmem:[#allocation12 + $0x10] sm:$0xff]  ;;  %v1346_v62 = vld [vmem:[#allocation12 + $0x8] sm:$0xff] }
 0x379   : > { %2622 = vmatprep.subr.mxu1 %v1356_v42  ;;  %2567 = vmatpush3.msra.mxu0 %v1388_v41  ;;  %v1377_v63 = vld [vmem:[#allocation12 + $0x80] sm:$0xff]  ;;  %v1361_v2 = vld [vmem:[#allocation5 + $0x28] sm:$0xff]  ;;  %v1329_v3 = vld [vmem:[#allocation4 + $0x30] sm:$0xff] }
 0x37a   : > { %2623 = vmatpush3.msra.mxu1 %v1356_v42  ;;  %2568 = vmatprep.subr.mxu0 %v1387_v43  ;;  %v1345_v1 = vld [vmem:[#allocation12] sm:$0xff]  ;;  %v1362_v4 = vld [vmem:[#allocation5 + $0x68] sm:$0xff]  ;;  %v1363_v0 = vld [vmem:[#allocation5 + $0x10] sm:$0xff] }
 0x37b   : > { %2624 = vmatprep.subr.mxu1 %v1355_v44  ;;  %2569 = vmatpush3.msra.mxu0 %v1387_v43  ;;  %v1330_v5 = vld [vmem:[#allocation4] sm:$0xff]  ;;  %v1331_v6 = vld [vmem:[#allocation4 + $0x58] sm:$0xff]  ;;  %v1365_v10 = vld [vmem:[#allocation5 + $0x48] sm:$0xff] }
 0x37c   : > { %2625 = vmatpush3.msra.mxu1 %v1355_v44  ;;  %2570 = vmatprep.subr.mxu0 %v1386_v45  ;;  %v1737_v7 = vld [vmem:[#allocation13 + $0x78] sm:$0xff]  ;;  %v1364_v8 = vld [vmem:[#allocation5 + $0x40] sm:$0xff]  ;;  %v1333_v11 = vld [vmem:[#allocation4 + $0x50] sm:$0xff] }
 0x37d   : > { %2626 = vmatprep.subr.mxu1 %v1354_v46  ;;  %2571 = vmatpush3.msra.mxu0 %v1386_v45  ;;  %v1332_v9 = vld [vmem:[#allocation4 + $0x18] sm:$0xff]  ;;  %v1736_v12 = vld [vmem:[#allocation13 + $0x70] sm:$0xff]  ;;  %v1334_v14 = vld [vmem:[#allocation4 + $0x68] sm:$0xff] }
 0x37e   : > { %2627 = vmatpush3.msra.mxu1 %v1354_v46  ;;  %2572 = vmatprep.subr.mxu0 %v1385_v47  ;;  %v1366_v13 = vld [vmem:[#allocation5 + $0x30] sm:$0xff]  ;;  %v1335_v16 = vld [vmem:[#allocation4 + $0x8] sm:$0xff]  ;;  %v1368_v18 = vld [vmem:[#allocation5 + $0x38] sm:$0xff] }
 0x37f   : > { %2628 = vmatprep.subr.mxu1 %v1353_v48  ;;  %2573 = vmatpush3.msra.mxu0 %v1385_v47  ;;  %v1367_v15 = vld [vmem:[#allocation5 + $0x70] sm:$0xff]  ;;  %v1735_v17 = vld [vmem:[#allocation13 + $0x68] sm:$0xff]  ;;  %v1369_v20 = vld [vmem:[#allocation5 + $0x20] sm:$0xff] }
 0x380   : > { %2629 = vmatpush3.msra.mxu1 %v1353_v48  ;;  %2574 = vmatprep.subr.mxu0 %v1384_v49  ;;  %v1336_v19 = vld [vmem:[#allocation4 + $0x48] sm:$0xff]  ;;  %v1337_v21 = vld [vmem:[#allocation4 + $0x40] sm:$0xff]  ;;  %v1370_v23 = vld [vmem:[#allocation5 + $0x78] sm:$0xff] }
 0x381   : > { %2630 = vmatprep.subr.mxu1 %v1352_v50  ;;  %2575 = vmatpush3.msra.mxu0 %v1384_v49  ;;  %v1734_v22 = vld [vmem:[#allocation13 + $0x60] sm:$0xff]  ;;  %v1371_v25 = vld [vmem:[#allocation5 + $0x18] sm:$0xff]  ;;  %v1339_v26 = vld [vmem:[#allocation4 + $0x10] sm:$0xff] }
 0x382   : > { %2631 = vmatpush3.msra.mxu1 %v1352_v50  ;;  %2576 = vmatprep.subr.mxu0 %v1383_v51  ;;  %v1338_v24 = vld [vmem:[#allocation4 + $0x20] sm:$0xff]  ;;  %v1733_v27 = vld [vmem:[#allocation13 + $0x58] sm:$0xff]  ;;  %v1732_v32 = vld [vmem:[#allocation13 + $0x50] sm:$0xff] }
 0x383   : > { %2632 = vmatprep.subr.mxu1 %v1351_v52  ;;  %2577 = vmatpush3.msra.mxu0 %v1383_v51  ;;  %v1372_v28 = vld [vmem:[#allocation5 + $0x58] sm:$0xff]  ;;  %v1373_v30 = vld [vmem:[#allocation5] sm:$0xff]  ;;  %v1374_v33 = vld [vmem:[#allocation5 + $0x8] sm:$0xff] }
 0x384   : > { %2633 = vmatpush3.msra.mxu1 %v1351_v52  ;;  %2578 = vmatprep.subr.mxu0 %v1382_v53  ;;  %v1340_v29 = vld [vmem:[#allocation4 + $0x38] sm:$0xff]  ;;  %v1341_v31 = vld [vmem:[#allocation4 + $0x60] sm:$0xff]  ;;  %v1342_v34 = vld [vmem:[#allocation4 + $0x70] sm:$0xff] }
 0x385   : > { %2634 = vmatprep.subr.mxu1 %v1350_v54  ;;  %2579 = vmatpush3.msra.mxu0 %v1382_v53  ;;  %v1375_v35 = vld [vmem:[#allocation5 + $0x60] sm:$0xff]  ;;  %v1343_v36 = vld [vmem:[#allocation4 + $0x78] sm:$0xff]  ;;  %v1731_v37 = vld [vmem:[#allocation13 + $0x48] sm:$0xff] }
 0x386   : > { %2635 = vmatpush3.msra.mxu1 %v1350_v54  ;;  %2580 = vmatprep.subr.mxu0 %v1381_v55  ;;  %v1376_v38 = vld [vmem:[#allocation5 + $0x50] sm:$0xff]  ;;  %v1344_v39 = vld [vmem:[#allocation4 + $0x28] sm:$0xff]  ;;  %v1730_v40 = vld [vmem:[#allocation13 + $0x40] sm:$0xff] }
 0x387   : > { %2636 = vmatprep.subr.mxu1 %v1349_v56  ;;  %2581 = vmatpush3.msra.mxu0 %v1381_v55  ;;  %v1729_v41 = vld [vmem:[#allocation13 + $0x38] sm:$0xff]  ;;  %v1728_v42 = vld [vmem:[#allocation13 + $0x30] sm:$0xff]  ;;  %v1727_v43 = vld [vmem:[#allocation13 + $0x28] sm:$0xff] }
 0x388   : > { %2637 = vmatpush3.msra.mxu1 %v1349_v56  ;;  %2582 = vmatprep.subr.mxu0 %v1380_v57  ;;  %v1726_v44 = vld [vmem:[#allocation13 + $0x20] sm:$0xff]  ;;  %v1725_v45 = vld [vmem:[#allocation13 + $0x18] sm:$0xff]  ;;  %v1724_v46 = vld [vmem:[#allocation13 + $0x10] sm:$0xff] }
 0x389   : > { %2638 = vmatprep.subr.mxu1 %v1348_v58  ;;  %2583 = vmatpush3.msra.mxu0 %v1380_v57  ;;  %v1723_v47 = vld [vmem:[#allocation13 + $0x8] sm:$0xff]  ;;  %v1722_v48 = vld [vmem:[#allocation13] sm:$0xff] }
 0x38a   : > { %2639 = vmatpush3.msra.mxu1 %v1348_v58  ;;  %2584 = vmatprep.subr.mxu0 %v1379_v59  ;;  %v3603_v52 = vld [vmem:[%s3659_s5] ss:$0 sm:$0xff] }
 0x38b   : > { %2640 = vmatprep.subr.mxu1 %v1347_v60  ;;  %2585 = vmatpush3.msra.mxu0 %v1379_v59 }
 0x38c   : > { %2641 = vmatpush3.msra.mxu1 %v1347_v60  ;;  %2586 = vmatprep.subr.mxu0 %v1378_v61 }
 0x38d   : > { %2642 = vmatprep.subr.mxu1 %v1346_v62  ;;  %2587 = vmatpush3.msra.mxu0 %v1378_v61 }
 0x38e   : > { %2643 = vmatpush3.msra.mxu1 %v1346_v62  ;;  %2588 = vmatprep.subr.mxu0 %v1377_v63 }
 0x38f   : > { %2644 = vmatprep.subr.mxu1 %v1345_v1  ;;  %2589 = vmatpush3.msra.mxu0 %v1377_v63 }
 0x390   : > { %2590 = vmatprep.mubr.f32.mxu0 %v1361_v2  ;;  %2645 = vmatpush3.msra.mxu1 %v1345_v1 }
 0x391   : > { %2646 = vmatprep.mubr.f32.mxu1 %v1329_v3  ;;  %2591 = vmatmul.mubr.f32.vlgmr.msra.gmra.mxu0 %v1362_v4 }
 0x392   : > { %2647 = vmatmul.mubr.f32.vlgmr.msra.gmra.mxu1 %v1330_v5  ;;  %2593 = vmatprep.mubr.f32.mxu0 %v1363_v0 }
 0x393   : > { %2649 = vmatprep.mubr.f32.mxu1 %v1331_v6  ;;  %2670 = vmatprep.subr.mxu0 %v1737_v7 }
 0x394   : > { %2806 = vmatprep.subr.mxu1 %v1737_v7  ;;  %2671 = vmatpush3.msra.mxu0 %v1737_v7 }
 0x395   : > { %2822 = vmatpush3.msra.mxu1 %v1737_v7  ;;  %2594 = vmatmul.mubr.f32.gmra.mxu0 %v1364_v8 }
 0x396   : > { %2650 = vmatmul.mubr.f32.gmra.mxu1 %v1332_v9  ;;  %2596 = vmatprep.mubr.f32.mxu0 %v1365_v10 }
 0x397   : > { %2652 = vmatprep.mubr.f32.mxu1 %v1333_v11  ;;  %2672 = vmatprep.subr.mxu0 %v1736_v12 }
 0x398   : > { %2807 = vmatprep.subr.mxu1 %v1736_v12  ;;  %2673 = vmatpush3.msra.mxu0 %v1736_v12 }
 0x399   : > { %2823 = vmatpush3.msra.mxu1 %v1736_v12  ;;  %2597 = vmatmul.mubr.f32.gmra.mxu0 %v1366_v13 }
 0x39a   : > { %2653 = vmatmul.mubr.f32.gmra.mxu1 %v1334_v14  ;;  %2599 = vmatprep.mubr.f32.mxu0 %v1367_v15 }
 0x39b   : > { %2655 = vmatprep.mubr.f32.mxu1 %v1335_v16  ;;  %2674 = vmatprep.subr.mxu0 %v1735_v17 }
 0x39c   : > { %2808 = vmatprep.subr.mxu1 %v1735_v17  ;;  %2675 = vmatpush3.msra.mxu0 %v1735_v17 }
 0x39d   : > { %2824 = vmatpush3.msra.mxu1 %v1735_v17  ;;  %2600 = vmatmul.mubr.f32.gmra.mxu0 %v1368_v18 }
 0x39e   : > { %2656 = vmatmul.mubr.f32.gmra.mxu1 %v1336_v19  ;;  %2602 = vmatprep.mubr.f32.mxu0 %v1369_v20 }
 0x39f   : > { %2658 = vmatprep.mubr.f32.mxu1 %v1337_v21  ;;  %2676 = vmatprep.subr.mxu0 %v1734_v22 }
 0x3a0   : > { %2809 = vmatprep.subr.mxu1 %v1734_v22  ;;  %2677 = vmatpush3.msra.mxu0 %v1734_v22 }
 0x3a1   : > { %2825 = vmatpush3.msra.mxu1 %v1734_v22  ;;  %2603 = vmatmul.mubr.f32.gmra.mxu0 %v1370_v23 }
 0x3a2   : > { %2659 = vmatmul.mubr.f32.gmra.mxu1 %v1338_v24  ;;  %2605 = vmatprep.mubr.f32.mxu0 %v1371_v25 }
 0x3a3   : > { %2661 = vmatprep.mubr.f32.mxu1 %v1339_v26  ;;  %2678 = vmatprep.subr.mxu0 %v1733_v27 }
 0x3a4   : > { %2810 = vmatprep.subr.mxu1 %v1733_v27  ;;  %2679 = vmatpush3.msra.mxu0 %v1733_v27 }
 0x3a5   : > { %2826 = vmatpush3.msra.mxu1 %v1733_v27  ;;  %2606 = vmatmul.mubr.f32.gmra.mxu0 %v1372_v28 }
 0x3a6   : > { %2662 = vmatmul.mubr.f32.gmra.mxu1 %v1340_v29  ;;  %2608 = vmatprep.mubr.f32.mxu0 %v1373_v30 }
 0x3a7   : > { %2664 = vmatprep.mubr.f32.mxu1 %v1341_v31  ;;  %2680 = vmatprep.subr.mxu0 %v1732_v32 }
 0x3a8   : > { %2811 = vmatprep.subr.mxu1 %v1732_v32  ;;  %2681 = vmatpush3.msra.mxu0 %v1732_v32 }
 0x3a9   : > { %2827 = vmatpush3.msra.mxu1 %v1732_v32  ;;  %2609 = vmatmul.mubr.f32.gmra.mxu0 %v1374_v33 }
 0x3aa   : > { %2665 = vmatmul.mubr.f32.gmra.mxu1 %v1342_v34  ;;  %2611 = vmatprep.mubr.f32.mxu0 %v1375_v35 }
 0x3ab   : > { %2667 = vmatprep.mubr.f32.mxu1 %v1343_v36  ;;  %2682 = vmatprep.subr.mxu0 %v1731_v37 }
 0x3ac   : > { %2812 = vmatprep.subr.mxu1 %v1731_v37  ;;  %2683 = vmatpush3.msra.mxu0 %v1731_v37 }
 0x3ad   : > { %2828 = vmatpush3.msra.mxu1 %v1731_v37  ;;  %2612 = vmatmul.mubr.f32.gmra.mxu0 %v1376_v38 }
 0x3ae   : > { %2668 = vmatmul.mubr.f32.gmra.mxu1 %v1344_v39  ;;  %2684 = vmatprep.subr.mxu0 %v1730_v40 }
 0x3af   : > { %2813 = vmatprep.subr.mxu1 %v1730_v40  ;;  %2685 = vmatpush3.msra.mxu0 %v1730_v40 }
 0x3b0   : > { %2829 = vmatpush3.msra.mxu1 %v1730_v40  ;;  %2686 = vmatprep.subr.mxu0 %v1729_v41 }
 0x3b1   : > { %2814 = vmatprep.subr.mxu1 %v1729_v41  ;;  %2687 = vmatpush3.msra.mxu0 %v1729_v41 }
 0x3b2   : > { %2830 = vmatpush3.msra.mxu1 %v1729_v41  ;;  %2688 = vmatprep.subr.mxu0 %v1728_v42 }
 0x3b3   : > { %2815 = vmatprep.subr.mxu1 %v1728_v42  ;;  %2689 = vmatpush3.msra.mxu0 %v1728_v42 }
 0x3b4   : > { %2831 = vmatpush3.msra.mxu1 %v1728_v42  ;;  %2690 = vmatprep.subr.mxu0 %v1727_v43 }
 0x3b5   : > { %2816 = vmatprep.subr.mxu1 %v1727_v43  ;;  %2691 = vmatpush3.msra.mxu0 %v1727_v43 }
 0x3b6   : > { %2832 = vmatpush3.msra.mxu1 %v1727_v43  ;;  %2692 = vmatprep.subr.mxu0 %v1726_v44 }
 0x3b7   : > { %2817 = vmatprep.subr.mxu1 %v1726_v44  ;;  %2693 = vmatpush3.msra.mxu0 %v1726_v44 }
 0x3b8   : > { %2833 = vmatpush3.msra.mxu1 %v1726_v44  ;;  %2694 = vmatprep.subr.mxu0 %v1725_v45 }
 0x3b9   : > { %2818 = vmatprep.subr.mxu1 %v1725_v45  ;;  %2695 = vmatpush3.msra.mxu0 %v1725_v45 }
 0x3ba   : > { %2834 = vmatpush3.msra.mxu1 %v1725_v45  ;;  %2696 = vmatprep.subr.mxu0 %v1724_v46 }
 0x3bb   : > { %2819 = vmatprep.subr.mxu1 %v1724_v46  ;;  %2697 = vmatpush3.msra.mxu0 %v1724_v46 }
 0x3bc   : > { %2835 = vmatpush3.msra.mxu1 %v1724_v46  ;;  %2698 = vmatprep.subr.mxu0 %v1723_v47 }
 0x3bd   : > { %2820 = vmatprep.subr.mxu1 %v1723_v47  ;;  %2699 = vmatpush3.msra.mxu0 %v1723_v47 }
 0x3be   : > { %2836 = vmatpush3.msra.mxu1 %v1723_v47  ;;  %2700 = vmatprep.subr.mxu0 %v1722_v48 }
 0x3bf   : > { %2821 = vmatprep.subr.mxu1 %v1722_v48  ;;  %2701 = vmatpush3.msra.mxu0 %v1722_v48 }
 0x3c0   : > { %2837 = vmatpush3.msra.mxu1 %v1722_v48 }
 0x451   : > { %v2592_v49 = vpop.f32.mrf.mxu0 }
 0x452   : > { %v2648_v50 = vpop.f32.mrf.mxu1 }
 0x453   : > { %v1610_v51 = vadd.f32 %v2648_v50, %v2592_v49  ;;  %v1459_v53 = vpop.f32.mrf.mxu0 }
 0x454   : > { %v1604_v54 = vpop.f32.mrf.mxu1 }
 0x455   : > { %v1605_v55 = vadd.f32 %v1604_v54, %v1459_v53  ;;  %v1691_v56 = vadd.f32 %v3603_v52, %v1610_v51  ;;  %v2595_v57 = vpop.f32.mrf.mxu0 }
 0x456   : > { %v2651_v58 = vpop.f32.mrf.mxu1 }
 0x457   : > { %v1690_v59 = vadd.f32 %v3603_v52, %v1605_v55  ;;  %v1620_v60 = vadd.f32 %v2651_v58, %v2595_v57  ;;  %v1469_v61 = vpop.f32.mrf.mxu0  ;;  %v1707_v2 = vmax.f32 %v1691_v56, 0.0 }
 0x458   : > { %v1614_v62 = vpop.f32.mrf.mxu1 }
 0x459   : > { %v1706_v63 = vmax.f32 %v1690_v59, 0.0  ;;  %v1615_v1 = vadd.f32 %v1614_v62, %v1469_v61  ;;  %v1693_v3 = vadd.f32 %v3603_v52, %v1620_v60  ;;  %v2598_v4 = vpop.f32.mrf.mxu0 }
 0x45a   : > { %v2654_v5 = vpop.f32.mrf.mxu1 }
 0x45b   : > { %v1692_v0 = vadd.f32 %v3603_v52, %v1615_v1  ;;  %v1630_v6 = vadd.f32 %v2654_v5, %v2598_v4  ;;  %2702 = vmatprep.mubr.f32.mxu0 %v1706_v63  ;;  %v1479_v7 = vpop.f32.mrf.mxu0  ;;  %v1709_v11 = vmax.f32 %v1693_v3, 0.0  ;;  %v2105_v4 = vld [vmem:[%s3661_s7] ss:$0 sm:$0xff] }
 0x45c   : > { %v1624_v8 = vpop.f32.mrf.mxu1  ;;  %2703 = vmatmul.mubr.f32.vlgmr.msra.gmra.mxu0 %v1707_v2 }
 0x45d   : > { %v1708_v9 = vmax.f32 %v1692_v0, 0.0  ;;  %v1625_v10 = vadd.f32 %v1624_v8, %v1479_v7  ;;  %v1695_v12 = vadd.f32 %v3603_v52, %v1630_v6  ;;  %v2601_v13 = vpop.f32.mrf.mxu0 }
 0x45e   : > { %v2657_v14 = vpop.f32.mrf.mxu1 }
 0x45f   : > { %v1694_v15 = vadd.f32 %v3603_v52, %v1625_v10  ;;  %v1640_v16 = vadd.f32 %v2657_v14, %v2601_v13  ;;  %2705 = vmatprep.mubr.f32.mxu0 %v1708_v9  ;;  %v1489_v17 = vpop.f32.mrf.mxu0  ;;  %v1711_v21 = vmax.f32 %v1695_v12, 0.0 }
 0x460   : > { %v1634_v18 = vpop.f32.mrf.mxu1  ;;  %2706 = vmatmul.mubr.f32.gmra.mxu0 %v1709_v11 }
 0x461   : > { %v1710_v19 = vmax.f32 %v1694_v15, 0.0  ;;  %v1635_v20 = vadd.f32 %v1634_v18, %v1489_v17  ;;  %v1697_v22 = vadd.f32 %v3603_v52, %v1640_v16  ;;  %v2604_v23 = vpop.f32.mrf.mxu0 }
 0x462   : > { %v2660_v24 = vpop.f32.mrf.mxu1 }
 0x463   : > { %v1696_v25 = vadd.f32 %v3603_v52, %v1635_v20  ;;  %v1650_v26 = vadd.f32 %v2660_v24, %v2604_v23  ;;  %2708 = vmatprep.mubr.f32.mxu0 %v1710_v19  ;;  %v1499_v27 = vpop.f32.mrf.mxu0  ;;  %v1713_v31 = vmax.f32 %v1697_v22, 0.0 }
 0x464   : > { %v1644_v28 = vpop.f32.mrf.mxu1  ;;  %2709 = vmatmul.mubr.f32.gmra.mxu0 %v1711_v21 }
 0x465   : > { %v1712_v29 = vmax.f32 %v1696_v25, 0.0  ;;  %v1645_v30 = vadd.f32 %v1644_v28, %v1499_v27  ;;  %v1699_v32 = vadd.f32 %v3603_v52, %v1650_v26  ;;  %v2607_v33 = vpop.f32.mrf.mxu0 }
 0x466   : > { %v2663_v34 = vpop.f32.mrf.mxu1 }
 0x467   : > { %v1698_v35 = vadd.f32 %v3603_v52, %v1645_v30  ;;  %v1660_v36 = vadd.f32 %v2663_v34, %v2607_v33  ;;  %2711 = vmatprep.mubr.f32.mxu0 %v1712_v29  ;;  %v1509_v37 = vpop.f32.mrf.mxu0  ;;  %v1715_v41 = vmax.f32 %v1699_v32, 0.0 }
 0x468   : > { %v1654_v38 = vpop.f32.mrf.mxu1  ;;  %2712 = vmatmul.mubr.f32.gmra.mxu0 %v1713_v31 }
 0x469   : > { %v1714_v39 = vmax.f32 %v1698_v35, 0.0  ;;  %v1655_v40 = vadd.f32 %v1654_v38, %v1509_v37  ;;  %v1701_v42 = vadd.f32 %v3603_v52, %v1660_v36  ;;  %v2610_v43 = vpop.f32.mrf.mxu0 }
 0x46a   : > { %v2666_v44 = vpop.f32.mrf.mxu1 }
 0x46b   : > { %v1700_v45 = vadd.f32 %v3603_v52, %v1655_v40  ;;  %v1670_v46 = vadd.f32 %v2666_v44, %v2610_v43  ;;  %2714 = vmatprep.mubr.f32.mxu1 %v1714_v39  ;;  %v1519_v47 = vpop.f32.mrf.mxu0  ;;  %v1717_v51 = vmax.f32 %v1701_v42, 0.0 }
 0x46c   : > { %v1664_v48 = vpop.f32.mrf.mxu1  ;;  %2715 = vmatmul.mubr.f32.vlgmr.msra.gmra.mxu1 %v1715_v41 }
 0x46d   : > { %v1716_v49 = vmax.f32 %v1700_v45, 0.0  ;;  %v1665_v50 = vadd.f32 %v1664_v48, %v1519_v47  ;;  %v1703_v53 = vadd.f32 %v3603_v52, %v1670_v46  ;;  %v2613_v54 = vpop.f32.mrf.mxu0 }
 0x46e   : > { %v2669_v55 = vpop.f32.mrf.mxu1 }
 0x46f   : > { %v1702_v56 = vadd.f32 %v3603_v52, %v1665_v50  ;;  %v1680_v57 = vadd.f32 %v2669_v55, %v2613_v54  ;;  %2717 = vmatprep.mubr.f32.mxu1 %v1716_v49  ;;  %v1529_v58 = vpop.f32.mrf.mxu0  ;;  %v1719_v62 = vmax.f32 %v1703_v53, 0.0 }
 0x470   : > { %v1674_v59 = vpop.f32.mrf.mxu1  ;;  %2718 = vmatmul.mubr.f32.gmra.mxu1 %v1717_v51 }
 0x471   : > { %v1718_v60 = vmax.f32 %v1702_v56, 0.0  ;;  %v1675_v61 = vadd.f32 %v1674_v59, %v1529_v58  ;;  %v1705_v63 = vadd.f32 %v3603_v52, %v1680_v57 }
 0x473   : > { %v1704_v1 = vadd.f32 %v3603_v52, %v1675_v61  ;;  %2720 = vmatprep.mubr.f32.mxu1 %v1718_v60  ;;  %v1721_v3 = vmax.f32 %v1705_v63, 0.0 }
 0x474   : > { %2721 = vmatmul.mubr.f32.gmra.mxu1 %v1719_v62 }
 0x475   : > { %v1720_v2 = vmax.f32 %v1704_v1, 0.0 }
 0x477   : > { %2723 = vmatprep.mubr.f32.mxu1 %v1720_v2 }
 0x478   : > { %2724 = vmatmul.mubr.f32.gmra.mxu1 %v1721_v3 }
 0x51c   : > { %v2704_v5 = vpop.f32.mrf.mxu0 }
 0x51d   : > { %v1817_v0 = vadd.f32 %v2704_v5, %v2105_v4 }
 0x51e   : > { %v1811_v6 = vpop.f32.mrf.mxu0 }
 0x51f   : > { %1891 = vst [vmem:[#allocation15 + $0x8] sm:$0xff] %v1817_v0  ;;  %v1812_v7 = vadd.f32 %v2105_v4, %v1811_v6 }
 0x520   : > { %v2707_v8 = vpop.f32.mrf.mxu0 }
 0x521   : > { %1890 = vst [vmem:[#allocation15] sm:$0xff] %v1812_v7  ;;  %v1827_v9 = vadd.f32 %v2707_v8, %v2105_v4 }
 0x522   : > { %v1821_v10 = vpop.f32.mrf.mxu0 }
 0x523   : > { %1893 = vst [vmem:[#allocation15 + $0x18] sm:$0xff] %v1827_v9  ;;  %v1822_v52 = vadd.f32 %v2105_v4, %v1821_v10 }
 0x524   : > { %v2710_v11 = vpop.f32.mrf.mxu0 }
 0x525   : > { %1892 = vst [vmem:[#allocation15 + $0x10] sm:$0xff] %v1822_v52  ;;  %v1837_v12 = vadd.f32 %v2710_v11, %v2105_v4 }
 0x526   : > { %v1831_v13 = vpop.f32.mrf.mxu0 }
 0x527   : > { %1895 = vst [vmem:[#allocation15 + $0x28] sm:$0xff] %v1837_v12  ;;  %v1832_v14 = vadd.f32 %v2105_v4, %v1831_v13 }
 0x528   : > { %v2713_v15 = vpop.f32.mrf.mxu0 }
 0x529   : > { %1894 = vst [vmem:[#allocation15 + $0x20] sm:$0xff] %v1832_v14  ;;  %v1847_v16 = vadd.f32 %v2713_v15, %v2105_v4 }
 0x52a   : > { %v1841_v17 = vpop.f32.mrf.mxu0 }
 0x52b   : > { %1897 = vst [vmem:[#allocation15 + $0x38] sm:$0xff] %v1847_v16  ;;  %v1842_v18 = vadd.f32 %v2105_v4, %v1841_v17 }
 0x52c   : > { %v2716_v19 = vpop.f32.mrf.mxu1 }
 0x52d   : > { %1896 = vst [vmem:[#allocation15 + $0x30] sm:$0xff] %v1842_v18  ;;  %v1857_v20 = vadd.f32 %v2716_v19, %v2105_v4 }
 0x52e   : > { %v1851_v21 = vpop.f32.mrf.mxu1 }
 0x52f   : > { %1899 = vst [vmem:[#allocation15 + $0x48] sm:$0xff] %v1857_v20  ;;  %v1852_v22 = vadd.f32 %v2105_v4, %v1851_v21 }
 0x530   : > { %v2719_v23 = vpop.f32.mrf.mxu1 }
 0x531   : > { %1898 = vst [vmem:[#allocation15 + $0x40] sm:$0xff] %v1852_v22  ;;  %v1867_v24 = vadd.f32 %v2719_v23, %v2105_v4 }
 0x532   : > { %v1861_v25 = vpop.f32.mrf.mxu1 }
 0x533   : > { %1901 = vst [vmem:[#allocation15 + $0x58] sm:$0xff] %v1867_v24  ;;  %v1862_v26 = vadd.f32 %v2105_v4, %v1861_v25 }
 0x534   : > { %v2722_v27 = vpop.f32.mrf.mxu1 }
 0x535   : > { %1900 = vst [vmem:[#allocation15 + $0x50] sm:$0xff] %v1862_v26  ;;  %v1877_v28 = vadd.f32 %v2722_v27, %v2105_v4 }
 0x536   : > { %v1871_v29 = vpop.f32.mrf.mxu1 }
 0x537   : > { %1903 = vst [vmem:[#allocation15 + $0x68] sm:$0xff] %v1877_v28  ;;  %v1872_v30 = vadd.f32 %v2105_v4, %v1871_v29 }
 0x538   : > { %v2725_v31 = vpop.f32.mrf.mxu1 }
 0x539   : > { %1902 = vst [vmem:[#allocation15 + $0x60] sm:$0xff] %v1872_v30  ;;  %v1887_v32 = vadd.f32 %v2725_v31, %v2105_v4 }
 0x53a   : > { %v1881_v33 = vpop.f32.mrf.mxu1 }
 0x53b   : > { %1905 = vst [vmem:[#allocation15 + $0x78] sm:$0xff] %v1887_v32  ;;  %v1882_v34 = vadd.f32 %v2105_v4, %v1881_v33 }
 0x53d   : > { %1904 = vst [vmem:[#allocation15 + $0x70] sm:$0xff] %v1882_v34 }
 0x53e PF: > { %p2886_p3 = scmp.eq.s32.totalorder %s3277_s11, 1  ;;  %s3200_s20 = smov [#allocation15]  }
 0x53f   : > { %s1912_s26 = sshll.u32 %s3200_s20, 4  ;;  %s1913_s26 = int_to_ptr.vmem [resolvable:$true] %s1912_s26 }
 0x540   : > { %s3095_s0 = scalar_lea.vmem %s1913_s26, 2048  ;;  %p3102_p12 = scmp.lt.s32.totalorder %s1913_s26, %s1913_s26 }
 0x541   : > { %p3096_p6 = scmp.ne.s32.totalorder %s1913_s26, %s3095_s0  ;;  %p3103_p11 = scmp.lt.s32.totalorder %s3095_s0, %s3095_s0 }
 0x543   : > { %p3097_p9 = pnand %p3096_p6, %p2886_p3  ;;  %p3104_p5 = por %p3103_p11, %p3102_p12 }
 0x545   : > { %p3098_p10 = pneg %p3097_p9 }
 0x547   : > { %p3105_p7 = pnand %p3104_p5, %p3098_p10 }
 0x549   : > { %3108 = shalt.err (!%p3105_p7)
}
 0x54a   : > { %s3201_s25 = smov 128   ;;  %s3202_s13 = smov 8  }
 0x54b   : > { %2857 = dma.vmem_to_hbm [thread:$0]  (%p2886_p3), %s1913_s26, 2048, %s3662_s8, [#allocation8], %s3201_s25, %s3201_s25, %s3202_s13  }
 0x54c   : > { %3164 = dma.done.wait (%p2886_p3), [#allocation8], 2048  }
 0x54d   : > { %3166 = vsyncadd (%p2886_p3), [#allocation8], 4294965248 }
 0x54e PF: > { %s22_s10 = sadd.s32 1, %s3189_s10   ;;  %s3682_s27 = smov %s3173_s28 }
 0x54f   : > { %p19_p1 = scmp.ge.s32.totalorder %s22_s10, 4   ;;  %s3683_s28 = smov %s3177_s29 }
 0x550   : > { %s3684_s29 = smov %s3358_s22  ;;  %s3685_s30 = smov %s3185_s9 }
 0x551   : > { %s3686_s9 = smov %s3688_s14  ;;  %21 = sbr.rel (!%p19_p1) target bundleno = 8 (0x8), region = 143 }
 0x556   :  { %1928 = vsyncpa [#allocation7], 1 }
 0x557   :  { %1930 = vsyncpa [#allocation7 + $0x1], 1 }
 0x558   :  { %1931 = vsyncpa [#allocation10], 1 }
 0x559   :  { %1932 = vsyncpa [#allocation14], 1 }
 0x55a   :  { %1933 = vsyncpa [#allocation8], 1 }
 0x55b   :  { %1935 = vsyncpa [#allocation8 + $0x1], 1 }

</bundles_post_ra>
